<compile_context>
chip_gen: v6e
topology: v6e:2x2x1
jax: 0.10.0
libtpu: 0.0.40
codegen_flags: <defaults>
</compile_context>

<pallas_src>
import functools
import math

import jax
import jax.numpy as jnp
from jax.experimental import pallas as pl
from jax.experimental.pallas import tpu as pltpu


# --------------------------------------------------------------------------
# One-time capability probes / hardware-derived limits.
# --------------------------------------------------------------------------
_SINGLE_BUFFER_OK = None
_VMEM_LIMIT = "unset"


def _probe_kernel(x_ref, o_ref):
  o_ref[...] = x_ref[...] * 1.0


def _single_buffer_supported():
  """Can we use pipeline_mode=pl.Buffered(1) on constant-index inputs?"""
  global _SINGLE_BUFFER_OK
  if _SINGLE_BUFFER_OK is not None:
    return _SINGLE_BUFFER_OK
  try:
    spec = pl.BlockSpec((8, 128), lambda i: (0, 0),
                        pipeline_mode=pl.Buffered(1))
    fn = pl.pallas_call(
        _probe_kernel,
        grid=(2,),
        in_specs=[spec],
        out_specs=pl.BlockSpec((8, 128), lambda i: (0, 0)),
        out_shape=jax.ShapeDtypeStruct((8, 128), jnp.float32),
    )
    xp = jnp.arange(8 * 128, dtype=jnp.float32).reshape(8, 128)
    yp = jax.block_until_ready(fn(xp))
    _SINGLE_BUFFER_OK = bool(jnp.allclose(yp, xp))
  except Exception:
    _SINGLE_BUFFER_OK = False
  return _SINGLE_BUFFER_OK


def _vmem_limit_bytes():
  """Physical VMEM minus headroom for compiler scratch.

  v7x: 64 MiB - 16 MiB = 48 MiB;  v6e/v5e: 128 MiB - 16 MiB = 112 MiB.
  """
  global _VMEM_LIMIT
  if _VMEM_LIMIT == "unset":
    try:
      cap = int(pltpu.get_tpu_info().vmem_capacity_bytes)
      _VMEM_LIMIT = cap - 16 * 1024 * 1024 if cap > 32 * 1024 * 1024 else None
    except Exception:
      _VMEM_LIMIT = None
  return _VMEM_LIMIT


# --------------------------------------------------------------------------
# Fused transformer block kernel: one (batch, query-tile) grid step.
# --------------------------------------------------------------------------
def _block_kernel(*args, num_heads, head_dim, q_tile, vis, final_ln):
  f32 = jnp.float32
  bf16 = jnp.bfloat16

  n_in = 17 + (2 if final_ln else 0)
  n_out = 2 if vis else 1
  in_refs = args[:n_in]
  out_refs = args[n_in:n_in + n_out]
  ctx_ref = args[n_in + n_out]
  (x_ref, ln1g_ref, ln1b_ref,
   wq_ref, bq_ref, wk_ref, bk_ref, wv_ref, bv_ref, wo_ref, bo_ref,
   ln2g_ref, ln2b_ref, w1_ref, fb1_ref, w2_ref, fb2_ref) = in_refs[:17]
  if final_ln:
    encg_ref, encb_ref = in_refs[17], in_refs[18]
  y_ref = out_refs[0]
  probs_ref = out_refs[1] if vis else None

  S = x_ref.shape[0]

  def ln(v, g, b):                                    # LayerNorm, eps = 1e-6
    mu = jnp.mean(v, axis=-1, keepdims=True)
    var = jnp.mean(jnp.square(v - mu), axis=-1, keepdims=True)
    return (v - mu) * jax.lax.rsqrt(var + 1e-6) * g + b

  # --- attention_norm: computed once over the full sequence ---
  x_all = x_ref[...].astype(f32)                                   # (S, H)
  xn_all_bf = ln(x_all, ln1g_ref[...].astype(f32),
                 ln1b_ref[...].astype(f32)).astype(bf16)

  if q_tile == S:                         # default: no recompute at all
    x_q = x_all
    xn_q_bf = xn_all_bf
  else:                                   # optional v7x multi-core tiling
    q_start = pl.multiple_of(pl.program_id(1) * q_tile, q_tile)
    x_q = x_ref[pl.ds(q_start, q_tile), :].astype(f32)
    xn_q_bf = jax.lax.dynamic_slice_in_dim(xn_all_bf, q_start, q_tile, axis=0)

  # --- Q / K / V projections: bf16 operands, f32 accumulation.  The softmax
  #     scale 1/sqrt(head_dim) is folded into Q once. ---
  q = jnp.dot(xn_q_bf, wq_ref[...], preferred_element_type=f32) \
      + bq_ref[...].astype(f32)
  k = jnp.dot(xn_all_bf, wk_ref[...], preferred_element_type=f32) \
      + bk_ref[...].astype(f32)
  v = jnp.dot(xn_all_bf, wv_ref[...], preferred_element_type=f32) \
      + bv_ref[...].astype(f32)
  q_bf = (q * (1.0 / math.sqrt(head_dim))).astype(bf16)
  k_bf = k.astype(bf16)
  v_bf = v.astype(bf16)

  # --- multi-head scaled-dot-product attention ---
  # Per-head context written straight into a bf16 VMEM scratch (no concat,
  # no extra full-tile cast before the Wo matmul).
  for h in range(num_heads):
    sl = slice(h * head_dim, (h + 1) * head_dim)
    scores = jax.lax.dot_general(
        q_bf[:, sl], k_bf[:, sl], (((1,), (1,)), ((), ())),
        preferred_element_type=f32)                               # (TQ, S)
    scores = scores - jnp.max(scores, axis=-1, keepdims=True)
    e = jnp.exp(scores)
    probs = e * pl.reciprocal(jnp.sum(e, axis=-1, keepdims=True), approx=True)
    if vis:
      probs_ref[h] = probs.astype(probs_ref.dtype)
    ctx_ref[:, sl] = jnp.dot(probs.astype(bf16), v_bf[:, sl],
                             preferred_element_type=f32).astype(ctx_ref.dtype)

  # --- output projection + residual (dropouts = identity) ---
  attn_out = (jnp.dot(ctx_ref[...], wo_ref[...], preferred_element_type=f32)
              + bo_ref[...].astype(f32))
  h1 = attn_out + x_q

  # --- ffn_norm + MLP: fc1 -> exact GELU -> fc2 (dropout = identity) ---
  hn = ln(h1, ln2g_ref[...].astype(f32), ln2b_ref[...].astype(f32))
  m = (jnp.dot(hn.astype(bf16), w1_ref[...], preferred_element_type=f32)
       + fb1_ref[...].astype(f32))
  m = 0.5 * m * (1.0 + jax.lax.erf(m * (1.0 / math.sqrt(2.0))))
  m = (jnp.dot(m.astype(bf16), w2_ref[...], preferred_element_type=f32)
       + fb2_ref[...].astype(f32))
  out = m + h1

  if final_ln:  # fused encoder_norm epilogue on the last layer
    out = ln(out, encg_ref[...].astype(f32), encb_ref[...].astype(f32))

  y_ref[...] = out.astype(y_ref.dtype)


def transformer_block(x, p, num_heads, *, q_tile=None, vis=True,
                      final_ln_params=None, probs_dtype=jnp.float32):
  """One fused Block. Returns (y, attention_probs_or_None)."""
  B, S, H = x.shape
  head_dim = H // num_heads
  M = p["w1"].shape[1]

  if q_tile is None:
    q_tile = S                       # default: no K/V or LN recompute
  assert S % q_tile == 0, "q_tile must divide the sequence length"
  assert q_tile == S or q_tile % 8 == 0, "q_tile must be a sublane multiple"
  nq = S // q_tile

  bf16 = jnp.bfloat16
  wq, wk, wv, wo = (p[n].astype(bf16) for n in ("wq", "wk", "wv", "wo"))
  w1, w2 = p["w1"].astype(bf16), p["w2"].astype(bf16)

  final_ln = final_ln_params is not None
  kernel = functools.partial(_block_kernel, num_heads=num_heads,
                             head_dim=head_dim, q_tile=q_tile,
                             vis=vis, final_ln=final_ln)

  single_buffer = _single_buffer_supported()

  def wspec(shape):
    # Constant-index weight inputs: single-buffer them (their block index
    # never changes, so double buffering only wastes VMEM — critical on v7x).
    if single_buffer:
      return pl.BlockSpec(shape, lambda b, qi: (0, 0),
                          pipeline_mode=pl.Buffered(1))
    return pl.BlockSpec(shape, lambda b, qi: (0, 0))

  def cspec(shape):
    return pl.BlockSpec(shape, lambda b, qi: (0, 0))

  in_specs = [
      pl.BlockSpec((None, S, H), lambda b, qi: (b, 0, 0)),   # x (full seq)
      cspec((1, H)), cspec((1, H)),                          # ln1 gamma/beta
      wspec((H, H)), cspec((1, H)),                          # Wq, bq
      wspec((H, H)), cspec((1, H)),                          # Wk, bk
      wspec((H, H)), cspec((1, H)),                          # Wv, bv
      wspec((H, H)), cspec((1, H)),                          # Wo, bo
      cspec((1, H)), cspec((1, H)),                          # ln2 gamma/beta
      wspec((H, M)), cspec((1, M)),                          # W1, b1
      wspec((M, H)), cspec((1, H)),                          # W2, b2
  ]
  args = [x, p["ln1_g"], p["ln1_b"],
          wq, p["bq"], wk, p["bk"], wv, p["bv"], wo, p["bo"],
          p["ln2_g"], p["ln2_b"], w1, p["b1"], w2, p["b2"]]
  if final_ln:
    in_specs += [cspec((1, H)), cspec((1, H))]               # enc gamma/beta
    args += [final_ln_params[0], final_ln_params[1]]

  out_specs = [pl.BlockSpec((None, q_tile, H), lambda b, qi: (b, qi, 0))]
  out_shape = [jax.ShapeDtypeStruct((B, S, H), x.dtype)]
  if vis:
    out_specs.append(
        pl.BlockSpec((None, num_heads, q_tile, S), lambda b, qi: (b, 0, qi, 0)))
    out_shape.append(
        jax.ShapeDtypeStruct((B, num_heads, S, S), probs_dtype))

  fn = pl.pallas_call(
      kernel,
      grid=(B, nq),
      in_specs=in_specs,
      out_specs=out_specs,
      out_shape=out_shape,
      scratch_shapes=[pltpu.VMEM((q_tile, H), jnp.bfloat16)],  # ctx buffer
      compiler_params=pltpu.CompilerParams(
          dimension_semantics=("parallel", "parallel"),
          vmem_limit_bytes=_vmem_limit_bytes()),
  )
  outs = fn(*args)
  if vis:
    y, probs = outs
    return y, probs
  y = outs[0] if isinstance(outs, (list, tuple)) else outs
  return y, None


# --------------------------------------------------------------------------
# Standalone encoder LayerNorm (only used if num_layers == 0; otherwise the
# final LN is fused into the last block's epilogue).
# --------------------------------------------------------------------------
def _layernorm_kernel(x_ref, g_ref, b_ref, y_ref):
  x = x_ref[...].astype(jnp.float32)
  mu = jnp.mean(x, axis=-1, keepdims=True)
  var = jnp.mean(jnp.square(x - mu), axis=-1, keepdims=True)
  xn = (x - mu) * jax.lax.rsqrt(var + 1e-6)
  y_ref[...] = (xn * g_ref[...].astype(jnp.float32)
                + b_ref[...].astype(jnp.float32)).astype(y_ref.dtype)


def encoder_norm(x, g, b):
  B, S, H = x.shape
  return pl.pallas_call(
      _layernorm_kernel,
      grid=(B,),
      in_specs=[pl.BlockSpec((None, S, H), lambda i: (i, 0, 0)),
                pl.BlockSpec((1, H), lambda i: (0, 0)),
                pl.BlockSpec((1, H), lambda i: (0, 0))],
      out_specs=pl.BlockSpec((None, S, H), lambda i: (i, 0, 0)),
      out_shape=jax.ShapeDtypeStruct((B, S, H), x.dtype),
      compiler_params=pltpu.CompilerParams(
          dimension_semantics=("parallel",),
          vmem_limit_bytes=_vmem_limit_bytes()),
  )(x, g, b)


# --------------------------------------------------------------------------
# Encoder: sequential blocks; final LayerNorm fused into the last block.
# --------------------------------------------------------------------------
def encoder_forward(x, params, num_heads, q_tile=None, vis=True,
                    activation_dtype=None):
  # activation_dtype=jnp.bfloat16 halves inter-layer HBM traffic (v5e).
  h = x if activation_dtype is None else x.astype(activation_dtype)
  layers = params["layers"]
  attn_weights = []
  for i, lp in enumerate(layers):
    is_last = i == len(layers) - 1
    fln = (params["enc_g"], params["enc_b"]) if is_last else None
    h, probs = transformer_block(h, lp, num_heads, q_tile=q_tile, vis=vis,
                                 final_ln_params=fln)
    if vis:
      attn_weights.append(probs)
  if not layers:
    h = encoder_norm(h, params["enc_g"], params["enc_b"])
  return h, attn_weights


# --------------------------------------------------------------------------
# Pure-JAX (f32) reference of the PyTorch Encoder.forward (inference mode).
# --------------------------------------------------------------------------
def reference_encoder(x, params, num_heads):
  B, S, H = x.shape
  hd = H // num_heads

  def ln(v, g, b):
    mu = jnp.mean(v, axis=-1, keepdims=True)
    var = jnp.mean(jnp.square(v - mu), axis=-1, keepdims=True)
    return (v - mu) / jnp.sqrt(var + 1e-6) * g + b

  h = x
  attn_all = []
  for p in params["layers"]:
    xn = ln(h, p["ln1_g"], p["ln1_b"])
    q = xn @ p["wq"] + p["bq"]
    k = xn @ p["wk"] + p["bk"]
    v = xn @ p["wv"] + p["bv"]
    q = q.reshape(B, S, num_heads, hd).transpose(0, 2, 1, 3)
    k = k.reshape(B, S, num_heads, hd).transpose(0, 2, 1, 3)
    v = v.reshape(B, S, num_heads, hd).transpose(0, 2, 1, 3)
    scores = jnp.einsum("bhqd,bhkd->bhqk", q, k) / math.sqrt(hd)
    probs = jax.nn.softmax(scores, axis=-1)
    attn_all.append(probs)
    ctx = jnp.einsum("bhqk,bhkd->bhqd", probs, v)
    ctx = ctx.transpose(0, 2, 1, 3).reshape(B, S, H)
    attn_out = ctx @ p["wo"] + p["bo"]
    h1 = attn_out + h
    hn = ln(h1, p["ln2_g"], p["ln2_b"])
    m = hn @ p["w1"] + p["b1"]
    m = 0.5 * m * (1.0 + jax.lax.erf(m / math.sqrt(2.0)))
    m = m @ p["w2"] + p["b2"]
    h = m + h1
  encoded = ln(h, params["enc_g"], params["enc_b"])
  return encoded, attn_all


# --------------------------------------------------------------------------
# Parameter init (f32 master copies; wrapper casts matmul weights to bf16).
# --------------------------------------------------------------------------
def _init_layer(key, H, M):
  ks = jax.random.split(key, 8)

  def xavier(k, shape):
    fan_in, fan_out = shape
    lim = math.sqrt(6.0 / (fan_in + fan_out))
    return jax.random.uniform(k, shape, jnp.float32, -lim, lim)

  return {
      "ln1_g": jnp.ones((1, H), jnp.float32),
      "ln1_b": jnp.zeros((1, H), jnp.float32),
      "wq": xavier(ks[0], (H, H)), "bq": jnp.zeros((1, H), jnp.float32),
      "wk": xavier(ks[1], (H, H)), "bk": jnp.zeros((1, H), jnp.float32),
      "wv": xavier(ks[2], (H, H)), "bv": jnp.zeros((1, H), jnp.float32),
      "wo": xavier(ks[3], (H, H)), "bo": jnp.zeros((1, H), jnp.float32),
      "ln2_g": jnp.ones((1, H), jnp.float32),
      "ln2_b": jnp.zeros((1, H), jnp.float32),
      "w1": xavier(ks[4], (H, M)),
      "b1": 1e-6 * jax.random.normal(ks[5], (1, M), jnp.float32),
      "w2": xavier(ks[6], (M, H)),
      "b2": 1e-6 * jax.random.normal(ks[7], (1, H), jnp.float32),
  }


def init_params(key, H, M, num_layers):
  keys = jax.random.split(key, num_layers)
  return {
      "layers": [_init_layer(keys[l], H, M) for l in range(num_layers)],
      "enc_g": jnp.ones((1, H), jnp.float32),
      "enc_b": jnp.zeros((1, H), jnp.float32),
  }


if __name__ == "__main__":
  # batch, seq, hidden, mlp_dim, heads, layers
  B, S, H, M, NH, L = 2, 16, 32, 64, 4, 2

  key = jax.random.PRNGKey(0)
  kx, kp = jax.random.split(key)
  x = jax.random.normal(kx, (B, S, H), jnp.float32)
  params = init_params(kp, H, M, L)

  enc_ref, attn_ref = reference_encoder(x, params, NH)

  # Default path: q_tile = S (no LN/KV recompute), vis=True, fused final LN.
  encoded, attn = encoder_forward(x, params, NH)
  encoded = jax.block_until_ready(encoded)
  attn = [jax.block_until_ready(a) for a in attn]

  # Tolerances account for bf16 MXU operands (f32 accumulation everywhere)
  # and the approximate-reciprocal softmax denominator.
  assert jnp.allclose(encoded, enc_ref, atol=5e-2, rtol=5e-2), "output mismatch"
  for a, ar in zip(attn, attn_ref):
    assert jnp.allclose(a, ar, atol=4e-2, rtol=4e-2), "attn probs mismatch"

  # Query-tiled path (v7x: keeps both TensorCores busy when B is small).
  enc_t, attn_t = encoder_forward(x, params, NH, q_tile=8)
  enc_t = jax.block_until_ready(enc_t)
  assert jnp.allclose(enc_t, enc_ref, atol=5e-2, rtol=5e-2), "tiled mismatch"
  assert jnp.allclose(attn_t[0], attn_ref[0], atol=4e-2, rtol=4e-2)

  # vis=False path: attention-probs output (largest HBM write) is skipped.
  enc_nv, attn_nv = encoder_forward(x, params, NH, vis=False)
  enc_nv = jax.block_until_ready(enc_nv)
  assert attn_nv == []
  assert jnp.allclose(enc_nv, enc_ref, atol=5e-2, rtol=5e-2), "vis=False mismatch"

  print("KERNEL_OK")
</pallas_src>

<mosaic_0001>
module attributes {stable_mosaic.version = 11 : i64} {
  func.func @_probe_kernel(%arg0: i32, %arg1: memref<8x128xf32, #tpu.memory_space<vmem>>, %arg2: memref<8x128xf32, #tpu.memory_space<vmem>>) attributes {dimension_semantics = [#tpu.dimension_semantics<arbitrary>], iteration_bounds = array<i64: 2>, scalar_prefetch = 0 : i64, scratch_operands = 0 : i64, tpu.core_type = #tpu.core_type<tc>, window_params = [{pipeline_mode = #tpu.pipeline_mode<synchronous>, transform_indices = @transform_0, window_bounds = array<i64: 8, 128>}, {pipeline_mode = #tpu.pipeline_mode<synchronous>, transform_indices = @transform_1, window_bounds = array<i64: 8, 128>}]} {
    %c0 = arith.constant 0 : index
    %c0_0 = arith.constant 0 : index
    %0 = vector.load %arg1[%c0, %c0_0] : memref<8x128xf32, #tpu.memory_space<vmem>>, vector<8x128xf32>
    %cst = arith.constant 1.000000e+00 : f32
    %1 = vector.broadcast %cst : f32 to vector<8x128xf32>
    %2 = arith.mulf %0, %1 : vector<8x128xf32>
    %c0_1 = arith.constant 0 : index
    %c0_2 = arith.constant 0 : index
    %3 = vector.load %arg2[%c0_1, %c0_2] : memref<8x128xf32, #tpu.memory_space<vmem>>, vector<8x128xf32>
    tpu.vector_store %arg2[%c0_1, %c0_2], %2 {strides = array<i32>} : memref<8x128xf32, #tpu.memory_space<vmem>>, vector<8x128xf32>,
    return
  }
  func.func @transform_0(%arg0: i32) -> (i32, i32) {
    %c0_i32 = arith.constant 0 : i32
    %c0_i32_0 = arith.constant 0 : i32
    %c0_i32_1 = arith.constant 0 : i32
    return %c0_i32, %c0_i32_0 : i32, i32
  }
  func.func @transform_1(%arg0: i32) -> (i32, i32) {
    %c0_i32 = arith.constant 0 : i32
    %c0_i32_0 = arith.constant 0 : i32
    %c0_i32_1 = arith.constant 0 : i32
    return %c0_i32, %c0_i32_0 : i32, i32
  }
}

module attributes {stable_mosaic.version = 11 : i64} {
  func.func @_block_kernel(%arg0: i32, %arg1: i32, %arg2: memref<1x16x32xf32, #tpu.memory_space<vmem>>, %arg3: memref<1x32xf32, #tpu.memory_space<vmem>>, %arg4: memref<1x32xf32, #tpu.memory_space<vmem>>, %arg5: memref<32x32xbf16, #tpu.memory_space<vmem>>, %arg6: memref<1x32xf32, #tpu.memory_space<vmem>>, %arg7: memref<32x32xbf16, #tpu.memory_space<vmem>>, %arg8: memref<1x32xf32, #tpu.memory_space<vmem>>, %arg9: memref<32x32xbf16, #tpu.memory_space<vmem>>, %arg10: memref<1x32xf32, #tpu.memory_space<vmem>>, %arg11: memref<32x32xbf16, #tpu.memory_space<vmem>>, %arg12: memref<1x32xf32, #tpu.memory_space<vmem>>, %arg13: memref<1x32xf32, #tpu.memory_space<vmem>>, %arg14: memref<1x32xf32, #tpu.memory_space<vmem>>, %arg15: memref<32x64xbf16, #tpu.memory_space<vmem>>, %arg16: memref<1x64xf32, #tpu.memory_space<vmem>>, %arg17: memref<64x32xbf16, #tpu.memory_space<vmem>>, %arg18: memref<1x32xf32, #tpu.memory_space<vmem>>, %arg19: memref<1x16x32xf32, #tpu.memory_space<vmem>>, %arg20: memref<1x4x16x16xf32, #tpu.memory_space<vmem>>, %arg21: memref<16x32xbf16, #tpu.memory_space<vmem>>) attributes {dimension_semantics = [#tpu.dimension_semantics<parallel>, #tpu.dimension_semantics<parallel>], iteration_bounds = array<i64: 2, 1>, scalar_prefetch = 0 : i64, scratch_operands = 1 : i64, tpu.core_type = #tpu.core_type<tc>, window_params = [{transform_indices = @transform_0, window_bounds = array<i64: 1, 16, 32>}, {pipeline_mode = #tpu.pipeline_mode<synchronous>, transform_indices = @transform_1, window_bounds = array<i64: 1, 32>}, {pipeline_mode = #tpu.pipeline_mode<synchronous>, transform_indices = @transform_2, window_bounds = array<i64: 1, 32>}, {pipeline_mode = #tpu.pipeline_mode<synchronous>, transform_indices = @transform_3, window_bounds = array<i64: 32, 32>}, {pipeline_mode = #tpu.pipeline_mode<synchronous>, transform_indices = @transform_4, window_bounds = array<i64: 1, 32>}, {pipeline_mode = #tpu.pipeline_mode<synchronous>, transform_indices = @transform_5, window_bounds = array<i64: 32, 32>}, {pipeline_mode = #tpu.pipeline_mode<synchronous>, transform_indices = @transform_6, window_bounds = array<i64: 1, 32>}, {pipeline_mode = #tpu.pipeline_mode<synchronous>, transform_indices = @transform_7, window_bounds = array<i64: 32, 32>}, {pipeline_mode = #tpu.pipeline_mode<synchronous>, transform_indices = @transform_8, window_bounds = array<i64: 1, 32>}, {pipeline_mode = #tpu.pipeline_mode<synchronous>, transform_indices = @transform_9, window_bounds = array<i64: 32, 32>}, {pipeline_mode = #tpu.pipeline_mode<synchronous>, transform_indices = @transform_10, window_bounds = array<i64: 1, 32>}, {pipeline_mode = #tpu.pipeline_mode<synchronous>, transform_indices = @transform_11, window_bounds = array<i64: 1, 32>}, {pipeline_mode = #tpu.pipeline_mode<synchronous>, transform_indices = @transform_12, window_bounds = array<i64: 1, 32>}, {pipeline_mode = #tpu.pipeline_mode<synchronous>, transform_indices = @transform_13, window_bounds = array<i64: 32, 64>}, {pipeline_mode = #tpu.pipeline_mode<synchronous>, transform_indices = @transform_14, window_bounds = array<i64: 1, 64>}, {pipeline_mode = #tpu.pipeline_mode<synchronous>, transform_indices = @transform_15, window_bounds = array<i64: 64, 32>}, {pipeline_mode = #tpu.pipeline_mode<synchronous>, transform_indices = @transform_16, window_bounds = array<i64: 1, 32>}, {transform_indices = @transform_17, window_bounds = array<i64: 1, 16, 32>}, {transform_indices = @transform_18, window_bounds = array<i64: 1, 4, 16, 16>}]} {
    %c0 = arith.constant 0 : index
    %c0_0 = arith.constant 0 : index
    %c0_1 = arith.constant 0 : index
    %0 = vector.load %arg2[%c0, %c0_0, %c0_1] : memref<1x16x32xf32, #tpu.memory_space<vmem>>, vector<1x16x32xf32>
    %1 = vector.shape_cast %0 : vector<1x16x32xf32> to vector<16x32xf32>
    %c0_2 = arith.constant 0 : index
    %c0_3 = arith.constant 0 : index
    %2 = vector.load %arg3[%c0_2, %c0_3] : memref<1x32xf32, #tpu.memory_space<vmem>>, vector<1x32xf32>
    %c0_4 = arith.constant 0 : index
    %c0_5 = arith.constant 0 : index
    %3 = vector.load %arg4[%c0_4, %c0_5] : memref<1x32xf32, #tpu.memory_space<vmem>>, vector<1x32xf32>
    %cst = arith.constant dense<0.000000e+00> : vector<16xf32>
    %4 = vector.multi_reduction <add>, %1, %cst [1] : vector<16x32xf32> to vector<16xf32>
    %5 = vector.shape_cast %4 : vector<16xf32> to vector<16x1xf32>
    %cst_6 = arith.constant 3.200000e+01 : f32
    %6 = vector.broadcast %cst_6 : f32 to vector<16x1xf32>
    %7 = arith.divf %5, %6 : vector<16x1xf32>
    %8 = vector.broadcast %7 : vector<16x1xf32> to vector<16x32xf32>
    %9 = arith.subf %1, %8 : vector<16x32xf32>
    %10 = arith.mulf %9, %9 : vector<16x32xf32>
    %cst_7 = arith.constant dense<0.000000e+00> : vector<16xf32>
    %11 = vector.multi_reduction <add>, %10, %cst_7 [1] : vector<16x32xf32> to vector<16xf32>
    %12 = vector.shape_cast %11 : vector<16xf32> to vector<16x1xf32>
    %cst_8 = arith.constant 3.200000e+01 : f32
    %13 = vector.broadcast %cst_8 : f32 to vector<16x1xf32>
    %14 = arith.divf %12, %13 : vector<16x1xf32>
    %15 = vector.broadcast %7 : vector<16x1xf32> to vector<16x32xf32>
    %16 = arith.subf %1, %15 : vector<16x32xf32>
    %cst_9 = arith.constant 9.99999997E-7 : f32
    %17 = vector.broadcast %cst_9 : f32 to vector<16x1xf32>
    %18 = arith.addf %14, %17 : vector<16x1xf32>
    %19 = math.rsqrt %18 : vector<16x1xf32>
    %20 = vector.broadcast %19 : vector<16x1xf32> to vector<16x32xf32>
    %21 = arith.mulf %16, %20 : vector<16x32xf32>
    %22 = vector.broadcast %2 : vector<1x32xf32> to vector<16x32xf32>
    %23 = arith.mulf %21, %22 : vector<16x32xf32>
    %24 = vector.broadcast %3 : vector<1x32xf32> to vector<16x32xf32>
    %25 = arith.addf %23, %24 : vector<16x32xf32>
    %26 = arith.truncf %25 : vector<16x32xf32> to vector<16x32xbf16>
    %c0_10 = arith.constant 0 : index
    %c0_11 = arith.constant 0 : index
    %27 = vector.load %arg5[%c0_10, %c0_11] : memref<32x32xbf16, #tpu.memory_space<vmem>>, vector<32x32xbf16>
    %cst_12 = arith.constant dense<0.000000e+00> : vector<16x32xf32>
    %28 = tpu.matmul %26, %27, %cst_12 {dimension_numbers = #tpu.dot_dimension_numbers<[1], [0], [0], [1], [0, 0, 1, 1], [], []>} : vector<16x32xbf16>, vector<32x32xbf16>, vector<16x32xf32> -> vector<16x32xf32>
    %c0_13 = arith.constant 0 : index
    %c0_14 = arith.constant 0 : index
    %29 = vector.load %arg6[%c0_13, %c0_14] : memref<1x32xf32, #tpu.memory_space<vmem>>, vector<1x32xf32>
    %30 = vector.broadcast %29 : vector<1x32xf32> to vector<16x32xf32>
    %31 = arith.addf %28, %30 : vector<16x32xf32>
    %c0_15 = arith.constant 0 : index
    %c0_16 = arith.constant 0 : index
    %32 = vector.load %arg7[%c0_15, %c0_16] : memref<32x32xbf16, #tpu.memory_space<vmem>>, vector<32x32xbf16>
    %cst_17 = arith.constant dense<0.000000e+00> : vector<16x32xf32>
    %33 = tpu.matmul %26, %32, %cst_17 {dimension_numbers = #tpu.dot_dimension_numbers<[1], [0], [0], [1], [0, 0, 1, 1], [], []>} : vector<16x32xbf16>, vector<32x32xbf16>, vector<16x32xf32> -> vector<16x32xf32>
    %c0_18 = arith.constant 0 : index
    %c0_19 = arith.constant 0 : index
    %34 = vector.load %arg8[%c0_18, %c0_19] : memref<1x32xf32, #tpu.memory_space<vmem>>, vector<1x32xf32>
    %35 = vector.broadcast %34 : vector<1x32xf32> to vector<16x32xf32>
    %36 = arith.addf %33, %35 : vector<16x32xf32>
    %c0_20 = arith.constant 0 : index
    %c0_21 = arith.constant 0 : index
    %37 = vector.load %arg9[%c0_20, %c0_21] : memref<32x32xbf16, #tpu.memory_space<vmem>>, vector<32x32xbf16>
    %cst_22 = arith.constant dense<0.000000e+00> : vector<16x32xf32>
    %38 = tpu.matmul %26, %37, %cst_22 {dimension_numbers = #tpu.dot_dimension_numbers<[1], [0], [0], [1], [0, 0, 1, 1], [], []>} : vector<16x32xbf16>, vector<32x32xbf16>, vector<16x32xf32> -> vector<16x32xf32>
    %c0_23 = arith.constant 0 : index
    %c0_24 = arith.constant 0 : index
    %39 = vector.load %arg10[%c0_23, %c0_24] : memref<1x32xf32, #tpu.memory_space<vmem>>, vector<1x32xf32>
    %40 = vector.broadcast %39 : vector<1x32xf32> to vector<16x32xf32>
    %41 = arith.addf %38, %40 : vector<16x32xf32>
    %cst_25 = arith.constant 0.353553385 : f32
    %42 = vector.broadcast %cst_25 : f32 to vector<16x32xf32>
    %43 = arith.mulf %31, %42 : vector<16x32xf32>
    %44 = arith.truncf %43 : vector<16x32xf32> to vector<16x32xbf16>
    %45 = arith.truncf %36 : vector<16x32xf32> to vector<16x32xbf16>
    %46 = arith.truncf %41 : vector<16x32xf32> to vector<16x32xbf16>
    %47 = vector.extract_strided_slice %44 {offsets = [0, 0], sizes = [16, 8], strides = [1, 1]} : vector<16x32xbf16> to vector<16x8xbf16>
    %48 = vector.extract_strided_slice %45 {offsets = [0, 0], sizes = [16, 8], strides = [1, 1]} : vector<16x32xbf16> to vector<16x8xbf16>
    %cst_26 = arith.constant dense<0.000000e+00> : vector<16x16xf32>
    %49 = tpu.matmul %47, %48, %cst_26 {dimension_numbers = #tpu.dot_dimension_numbers<[1], [1], [0], [0], [0, 0, 1, 0], [], []>} : vector<16x8xbf16>, vector<16x8xbf16>, vector<16x16xf32> -> vector<16x16xf32>
    %cst_27 = arith.constant dense<0xFF800000> : vector<16xf32>
    %50 = vector.multi_reduction <maximumf>, %49, %cst_27 [1] : vector<16x16xf32> to vector<16xf32>
    %51 = vector.shape_cast %50 : vector<16xf32> to vector<16x1xf32>
    %52 = vector.broadcast %51 : vector<16x1xf32> to vector<16x16xf32>
    %53 = arith.subf %49, %52 : vector<16x16xf32>
    %54 = math.exp %53 : vector<16x16xf32>
    %cst_28 = arith.constant dense<0.000000e+00> : vector<16xf32>
    %55 = vector.multi_reduction <add>, %54, %cst_28 [1] : vector<16x16xf32> to vector<16xf32>
    %56 = vector.shape_cast %55 : vector<16xf32> to vector<16x1xf32>
    %57 = tpu.reciprocal %56 {approx = true} : vector<16x1xf32> -> vector<16x1xf32>
    %58 = vector.broadcast %57 : vector<16x1xf32> to vector<16x16xf32>
    %59 = arith.mulf %54, %58 : vector<16x16xf32>
    %c0_29 = arith.constant 0 : index
    %c0_30 = arith.constant 0 : index
    %c0_31 = arith.constant 0 : index
    %c0_32 = arith.constant 0 : index
    %60 = vector.load %arg20[%c0_29, %c0_30, %c0_31, %c0_32] : memref<1x4x16x16xf32, #tpu.memory_space<vmem>>, vector<1x1x16x16xf32>
    %61 = vector.shape_cast %60 : vector<1x1x16x16xf32> to vector<16x16xf32>
    %62 = vector.shape_cast %59 : vector<16x16xf32> to vector<1x1x16x16xf32>
    tpu.vector_store %arg20[%c0_29, %c0_30, %c0_31, %c0_32], %62 {strides = array<i32>} : memref<1x4x16x16xf32, #tpu.memory_space<vmem>>, vector<1x1x16x16xf32>,
    %63 = arith.truncf %59 : vector<16x16xf32> to vector<16x16xbf16>
    %64 = vector.extract_strided_slice %46 {offsets = [0, 0], sizes = [16, 8], strides = [1, 1]} : vector<16x32xbf16> to vector<16x8xbf16>
    %cst_33 = arith.constant dense<0.000000e+00> : vector<16x8xf32>
    %65 = tpu.matmul %63, %64, %cst_33 {dimension_numbers = #tpu.dot_dimension_numbers<[1], [0], [0], [1], [0, 0, 1, 1], [], []>} : vector<16x16xbf16>, vector<16x8xbf16>, vector<16x8xf32> -> vector<16x8xf32>
    %66 = arith.truncf %65 : vector<16x8xf32> to vector<16x8xbf16>
    %c0_34 = arith.constant 0 : index
    %c0_35 = arith.constant 0 : index
    %67 = vector.load %arg21[%c0_34, %c0_35] : memref<16x32xbf16, #tpu.memory_space<vmem>>, vector<16x8xbf16>
    tpu.vector_store %arg21[%c0_34, %c0_35], %66 {strides = array<i32>} : memref<16x32xbf16, #tpu.memory_space<vmem>>, vector<16x8xbf16>,
    %68 = vector.extract_strided_slice %44 {offsets = [0, 8], sizes = [16, 8], strides = [1, 1]} : vector<16x32xbf16> to vector<16x8xbf16>
    %69 = vector.extract_strided_slice %45 {offsets = [0, 8], sizes = [16, 8], strides = [1, 1]} : vector<16x32xbf16> to vector<16x8xbf16>
    %cst_36 = arith.constant dense<0.000000e+00> : vector<16x16xf32>
    %70 = tpu.matmul %68, %69, %cst_36 {dimension_numbers = #tpu.dot_dimension_numbers<[1], [1], [0], [0], [0, 0, 1, 0], [], []>} : vector<16x8xbf16>, vector<16x8xbf16>, vector<16x16xf32> -> vector<16x16xf32>
    %cst_37 = arith.constant dense<0xFF800000> : vector<16xf32>
    %71 = vector.multi_reduction <maximumf>, %70, %cst_37 [1] : vector<16x16xf32> to vector<16xf32>
    %72 = vector.shape_cast %71 : vector<16xf32> to vector<16x1xf32>
    %73 = vector.broadcast %72 : vector<16x1xf32> to vector<16x16xf32>
    %74 = arith.subf %70, %73 : vector<16x16xf32>
    %75 = math.exp %74 : vector<16x16xf32>
    %cst_38 = arith.constant dense<0.000000e+00> : vector<16xf32>
    %76 = vector.multi_reduction <add>, %75, %cst_38 [1] : vector<16x16xf32> to vector<16xf32>
    %77 = vector.shape_cast %76 : vector<16xf32> to vector<16x1xf32>
    %78 = tpu.reciprocal %77 {approx = true} : vector<16x1xf32> -> vector<16x1xf32>
    %79 = vector.broadcast %78 : vector<16x1xf32> to vector<16x16xf32>
    %80 = arith.mulf %75, %79 : vector<16x16xf32>
    %c0_39 = arith.constant 0 : index
    %c1 = arith.constant 1 : index
    %c0_40 = arith.constant 0 : index
    %c0_41 = arith.constant 0 : index
    %81 = vector.load %arg20[%c0_39, %c1, %c0_40, %c0_41] : memref<1x4x16x16xf32, #tpu.memory_space<vmem>>, vector<1x1x16x16xf32>
    %82 = vector.shape_cast %81 : vector<1x1x16x16xf32> to vector<16x16xf32>
    %83 = vector.shape_cast %80 : vector<16x16xf32> to vector<1x1x16x16xf32>
    tpu.vector_store %arg20[%c0_39, %c1, %c0_40, %c0_41], %83 {strides = array<i32>} : memref<1x4x16x16xf32, #tpu.memory_space<vmem>>, vector<1x1x16x16xf32>,
    %84 = arith.truncf %80 : vector<16x16xf32> to vector<16x16xbf16>
    %85 = vector.extract_strided_slice %46 {offsets = [0, 8], sizes = [16, 8], strides = [1, 1]} : vector<16x32xbf16> to vector<16x8xbf16>
    %cst_42 = arith.constant dense<0.000000e+00> : vector<16x8xf32>
    %86 = tpu.matmul %84, %85, %cst_42 {dimension_numbers = #tpu.dot_dimension_numbers<[1], [0], [0], [1], [0, 0, 1, 1], [], []>} : vector<16x16xbf16>, vector<16x8xbf16>, vector<16x8xf32> -> vector<16x8xf32>
    %87 = arith.truncf %86 : vector<16x8xf32> to vector<16x8xbf16>
    %c0_43 = arith.constant 0 : index
    %c8 = arith.constant 8 : index
    %88 = vector.load %arg21[%c0_43, %c8] : memref<16x32xbf16, #tpu.memory_space<vmem>>, vector<16x8xbf16>
    tpu.vector_store %arg21[%c0_43, %c8], %87 {strides = array<i32>} : memref<16x32xbf16, #tpu.memory_space<vmem>>, vector<16x8xbf16>,
    %89 = vector.extract_strided_slice %44 {offsets = [0, 16], sizes = [16, 8], strides = [1, 1]} : vector<16x32xbf16> to vector<16x8xbf16>
    %90 = vector.extract_strided_slice %45 {offsets = [0, 16], sizes = [16, 8], strides = [1, 1]} : vector<16x32xbf16> to vector<16x8xbf16>
    %cst_44 = arith.constant dense<0.000000e+00> : vector<16x16xf32>
    %91 = tpu.matmul %89, %90, %cst_44 {dimension_numbers = #tpu.dot_dimension_numbers<[1], [1], [0], [0], [0, 0, 1, 0], [], []>} : vector<16x8xbf16>, vector<16x8xbf16>, vector<16x16xf32> -> vector<16x16xf32>
    %cst_45 = arith.constant dense<0xFF800000> : vector<16xf32>
    %92 = vector.multi_reduction <maximumf>, %91, %cst_45 [1] : vector<16x16xf32> to vector<16xf32>
    %93 = vector.shape_cast %92 : vector<16xf32> to vector<16x1xf32>
    %94 = vector.broadcast %93 : vector<16x1xf32> to vector<16x16xf32>
    %95 = arith.subf %91, %94 : vector<16x16xf32>
    %96 = math.exp %95 : vector<16x16xf32>
    %cst_46 = arith.constant dense<0.000000e+00> : vector<16xf32>
    %97 = vector.multi_reduction <add>, %96, %cst_46 [1] : vector<16x16xf32> to vector<16xf32>
    %98 = vector.shape_cast %97 : vector<16xf32> to vector<16x1xf32>
    %99 = tpu.reciprocal %98 {approx = true} : vector<16x1xf32> -> vector<16x1xf32>
    %100 = vector.broadcast %99 : vector<16x1xf32> to vector<16x16xf32>
    %101 = arith.mulf %96, %100 : vector<16x16xf32>
    %c0_47 = arith.constant 0 : index
    %c2 = arith.constant 2 : index
    %c0_48 = arith.constant 0 : index
    %c0_49 = arith.constant 0 : index
    %102 = vector.load %arg20[%c0_47, %c2, %c0_48, %c0_49] : memref<1x4x16x16xf32, #tpu.memory_space<vmem>>, vector<1x1x16x16xf32>
    %103 = vector.shape_cast %102 : vector<1x1x16x16xf32> to vector<16x16xf32>
    %104 = vector.shape_cast %101 : vector<16x16xf32> to vector<1x1x16x16xf32>
    tpu.vector_store %arg20[%c0_47, %c2, %c0_48, %c0_49], %104 {strides = array<i32>} : memref<1x4x16x16xf32, #tpu.memory_space<vmem>>, vector<1x1x16x16xf32>,
    %105 = arith.truncf %101 : vector<16x16xf32> to vector<16x16xbf16>
    %106 = vector.extract_strided_slice %46 {offsets = [0, 16], sizes = [16, 8], strides = [1, 1]} : vector<16x32xbf16> to vector<16x8xbf16>
    %cst_50 = arith.constant dense<0.000000e+00> : vector<16x8xf32>
    %107 = tpu.matmul %105, %106, %cst_50 {dimension_numbers = #tpu.dot_dimension_numbers<[1], [0], [0], [1], [0, 0, 1, 1], [], []>} : vector<16x16xbf16>, vector<16x8xbf16>, vector<16x8xf32> -> vector<16x8xf32>
    %108 = arith.truncf %107 : vector<16x8xf32> to vector<16x8xbf16>
    %c0_51 = arith.constant 0 : index
    %c16 = arith.constant 16 : index
    %109 = vector.load %arg21[%c0_51, %c16] : memref<16x32xbf16, #tpu.memory_space<vmem>>, vector<16x8xbf16>
    tpu.vector_store %arg21[%c0_51, %c16], %108 {strides = array<i32>} : memref<16x32xbf16, #tpu.memory_space<vmem>>, vector<16x8xbf16>,
    %110 = vector.extract_strided_slice %44 {offsets = [0, 24], sizes = [16, 8], strides = [1, 1]} : vector<16x32xbf16> to vector<16x8xbf16>
    %111 = vector.extract_strided_slice %45 {offsets = [0, 24], sizes = [16, 8], strides = [1, 1]} : vector<16x32xbf16> to vector<16x8xbf16>
    %cst_52 = arith.constant dense<0.000000e+00> : vector<16x16xf32>
    %112 = tpu.matmul %110, %111, %cst_52 {dimension_numbers = #tpu.dot_dimension_numbers<[1], [1], [0], [0], [0, 0, 1, 0], [], []>} : vector<16x8xbf16>, vector<16x8xbf16>, vector<16x16xf32> -> vector<16x16xf32>
    %cst_53 = arith.constant dense<0xFF800000> : vector<16xf32>
    %113 = vector.multi_reduction <maximumf>, %112, %cst_53 [1] : vector<16x16xf32> to vector<16xf32>
    %114 = vector.shape_cast %113 : vector<16xf32> to vector<16x1xf32>
    %115 = vector.broadcast %114 : vector<16x1xf32> to vector<16x16xf32>
    %116 = arith.subf %112, %115 : vector<16x16xf32>
    %117 = math.exp %116 : vector<16x16xf32>
    %cst_54 = arith.constant dense<0.000000e+00> : vector<16xf32>
    %118 = vector.multi_reduction <add>, %117, %cst_54 [1] : vector<16x16xf32> to vector<16xf32>
    %119 = vector.shape_cast %118 : vector<16xf32> to vector<16x1xf32>
    %120 = tpu.reciprocal %119 {approx = true} : vector<16x1xf32> -> vector<16x1xf32>
    %121 = vector.broadcast %120 : vector<16x1xf32> to vector<16x16xf32>
    %122 = arith.mulf %117, %121 : vector<16x16xf32>
    %c0_55 = arith.constant 0 : index
    %c3 = arith.constant 3 : index
    %c0_56 = arith.constant 0 : index
    %c0_57 = arith.constant 0 : index
    %123 = vector.load %arg20[%c0_55, %c3, %c0_56, %c0_57] : memref<1x4x16x16xf32, #tpu.memory_space<vmem>>, vector<1x1x16x16xf32>
    %124 = vector.shape_cast %123 : vector<1x1x16x16xf32> to vector<16x16xf32>
    %125 = vector.shape_cast %122 : vector<16x16xf32> to vector<1x1x16x16xf32>
    tpu.vector_store %arg20[%c0_55, %c3, %c0_56, %c0_57], %125 {strides = array<i32>} : memref<1x4x16x16xf32, #tpu.memory_space<vmem>>, vector<1x1x16x16xf32>,
    %126 = arith.truncf %122 : vector<16x16xf32> to vector<16x16xbf16>
    %127 = vector.extract_strided_slice %46 {offsets = [0, 24], sizes = [16, 8], strides = [1, 1]} : vector<16x32xbf16> to vector<16x8xbf16>
    %cst_58 = arith.constant dense<0.000000e+00> : vector<16x8xf32>
    %128 = tpu.matmul %126, %127, %cst_58 {dimension_numbers = #tpu.dot_dimension_numbers<[1], [0], [0], [1], [0, 0, 1, 1], [], []>} : vector<16x16xbf16>, vector<16x8xbf16>, vector<16x8xf32> -> vector<16x8xf32>
    %129 = arith.truncf %128 : vector<16x8xf32> to vector<16x8xbf16>
    %c0_59 = arith.constant 0 : index
    %c24 = arith.constant 24 : index
    %130 = vector.load %arg21[%c0_59, %c24] : memref<16x32xbf16, #tpu.memory_space<vmem>>, vector<16x8xbf16>
    tpu.vector_store %arg21[%c0_59, %c24], %129 {strides = array<i32>} : memref<16x32xbf16, #tpu.memory_space<vmem>>, vector<16x8xbf16>,
    %c0_60 = arith.constant 0 : index
    %c0_61 = arith.constant 0 : index
    %131 = vector.load %arg21[%c0_60, %c0_61] : memref<16x32xbf16, #tpu.memory_space<vmem>>, vector<16x32xbf16>
    %c0_62 = arith.constant 0 : index
    %c0_63 = arith.constant 0 : index
    %132 = vector.load %arg11[%c0_62, %c0_63] : memref<32x32xbf16, #tpu.memory_space<vmem>>, vector<32x32xbf16>
    %cst_64 = arith.constant dense<0.000000e+00> : vector<16x32xf32>
    %133 = tpu.matmul %131, %132, %cst_64 {dimension_numbers = #tpu.dot_dimension_numbers<[1], [0], [0], [1], [0, 0, 1, 1], [], []>} : vector<16x32xbf16>, vector<32x32xbf16>, vector<16x32xf32> -> vector<16x32xf32>
    %c0_65 = arith.constant 0 : index
    %c0_66 = arith.constant 0 : index
    %134 = vector.load %arg12[%c0_65, %c0_66] : memref<1x32xf32, #tpu.memory_space<vmem>>, vector<1x32xf32>
    %135 = vector.broadcast %134 : vector<1x32xf32> to vector<16x32xf32>
    %136 = arith.addf %133, %135 : vector<16x32xf32>
    %137 = arith.addf %136, %1 : vector<16x32xf32>
    %c0_67 = arith.constant 0 : index
    %c0_68 = arith.constant 0 : index
    %138 = vector.load %arg13[%c0_67, %c0_68] : memref<1x32xf32, #tpu.memory_space<vmem>>, vector<1x32xf32>
    %c0_69 = arith.constant 0 : index
    %c0_70 = arith.constant 0 : index
    %139 = vector.load %arg14[%c0_69, %c0_70] : memref<1x32xf32, #tpu.memory_space<vmem>>, vector<1x32xf32>
    %cst_71 = arith.constant dense<0.000000e+00> : vector<16xf32>
    %140 = vector.multi_reduction <add>, %137, %cst_71 [1] : vector<16x32xf32> to vector<16xf32>
    %141 = vector.shape_cast %140 : vector<16xf32> to vector<16x1xf32>
    %cst_72 = arith.constant 3.200000e+01 : f32
    %142 = vector.broadcast %cst_72 : f32 to vector<16x1xf32>
    %143 = arith.divf %141, %142 : vector<16x1xf32>
    %144 = vector.broadcast %143 : vector<16x1xf32> to vector<16x32xf32>
    %145 = arith.subf %137, %144 : vector<16x32xf32>
    %146 = arith.mulf %145, %145 : vector<16x32xf32>
    %cst_73 = arith.constant dense<0.000000e+00> : vector<16xf32>
    %147 = vector.multi_reduction <add>, %146, %cst_73 [1] : vector<16x32xf32> to vector<16xf32>
    %148 = vector.shape_cast %147 : vector<16xf32> to vector<16x1xf32>
    %cst_74 = arith.constant 3.200000e+01 : f32
    %149 = vector.broadcast %cst_74 : f32 to vector<16x1xf32>
    %150 = arith.divf %148, %149 : vector<16x1xf32>
    %151 = vector.broadcast %143 : vector<16x1xf32> to vector<16x32xf32>
    %152 = arith.subf %137, %151 : vector<16x32xf32>
    %cst_75 = arith.constant 9.99999997E-7 : f32
    %153 = vector.broadcast %cst_75 : f32 to vector<16x1xf32>
    %154 = arith.addf %150, %153 : vector<16x1xf32>
    %155 = math.rsqrt %154 : vector<16x1xf32>
    %156 = vector.broadcast %155 : vector<16x1xf32> to vector<16x32xf32>
    %157 = arith.mulf %152, %156 : vector<16x32xf32>
    %158 = vector.broadcast %138 : vector<1x32xf32> to vector<16x32xf32>
    %159 = arith.mulf %157, %158 : vector<16x32xf32>
    %160 = vector.broadcast %139 : vector<1x32xf32> to vector<16x32xf32>
    %161 = arith.addf %159, %160 : vector<16x32xf32>
    %162 = arith.truncf %161 : vector<16x32xf32> to vector<16x32xbf16>
    %c0_76 = arith.constant 0 : index
    %c0_77 = arith.constant 0 : index
    %163 = vector.load %arg15[%c0_76, %c0_77] : memref<32x64xbf16, #tpu.memory_space<vmem>>, vector<32x64xbf16>
    %cst_78 = arith.constant dense<0.000000e+00> : vector<16x64xf32>
    %164 = tpu.matmul %162, %163, %cst_78 {dimension_numbers = #tpu.dot_dimension_numbers<[1], [0], [0], [1], [0, 0, 1, 1], [], []>} : vector<16x32xbf16>, vector<32x64xbf16>, vector<16x64xf32> -> vector<16x64xf32>
    %c0_79 = arith.constant 0 : index
    %c0_80 = arith.constant 0 : index
    %165 = vector.load %arg16[%c0_79, %c0_80] : memref<1x64xf32, #tpu.memory_space<vmem>>, vector<1x64xf32>
    %166 = vector.broadcast %165 : vector<1x64xf32> to vector<16x64xf32>
    %167 = arith.addf %164, %166 : vector<16x64xf32>
    %cst_81 = arith.constant 5.000000e-01 : f32
    %168 = vector.broadcast %cst_81 : f32 to vector<16x64xf32>
    %169 = arith.mulf %168, %167 : vector<16x64xf32>
    %cst_82 = arith.constant 0.707106769 : f32
    %170 = vector.broadcast %cst_82 : f32 to vector<16x64xf32>
    %171 = arith.mulf %167, %170 : vector<16x64xf32>
    %172 = math.erf %171 : vector<16x64xf32>
    %cst_83 = arith.constant 1.000000e+00 : f32
    %173 = vector.broadcast %cst_83 : f32 to vector<16x64xf32>
    %174 = arith.addf %173, %172 : vector<16x64xf32>
    %175 = arith.mulf %169, %174 : vector<16x64xf32>
    %176 = arith.truncf %175 : vector<16x64xf32> to vector<16x64xbf16>
    %c0_84 = arith.constant 0 : index
    %c0_85 = arith.constant 0 : index
    %177 = vector.load %arg17[%c0_84, %c0_85] : memref<64x32xbf16, #tpu.memory_space<vmem>>, vector<64x32xbf16>
    %cst_86 = arith.constant dense<0.000000e+00> : vector<16x32xf32>
    %178 = tpu.matmul %176, %177, %cst_86 {dimension_numbers = #tpu.dot_dimension_numbers<[1], [0], [0], [1], [0, 0, 1, 1], [], []>} : vector<16x64xbf16>, vector<64x32xbf16>, vector<16x32xf32> -> vector<16x32xf32>
    %c0_87 = arith.constant 0 : index
    %c0_88 = arith.constant 0 : index
    %179 = vector.load %arg18[%c0_87, %c0_88] : memref<1x32xf32, #tpu.memory_space<vmem>>, vector<1x32xf32>
    %180 = vector.broadcast %179 : vector<1x32xf32> to vector<16x32xf32>
    %181 = arith.addf %178, %180 : vector<16x32xf32>
    %182 = arith.addf %181, %137 : vector<16x32xf32>
    %c0_89 = arith.constant 0 : index
    %c0_90 = arith.constant 0 : index
    %c0_91 = arith.constant 0 : index
    %183 = vector.load %arg19[%c0_89, %c0_90, %c0_91] : memref<1x16x32xf32, #tpu.memory_space<vmem>>, vector<1x16x32xf32>
    %184 = vector.shape_cast %183 : vector<1x16x32xf32> to vector<16x32xf32>
    %185 = vector.shape_cast %182 : vector<16x32xf32> to vector<1x16x32xf32>
    tpu.vector_store %arg19[%c0_89, %c0_90, %c0_91], %185 {strides = array<i32>} : memref<1x16x32xf32, #tpu.memory_space<vmem>>, vector<1x16x32xf32>,
    return
  }
  func.func @transform_0(%arg0: i32, %arg1: i32) -> (i32, i32, i32) {
    %c0_i32 = arith.constant 0 : i32
    %c0_i32_0 = arith.constant 0 : i32
    %c0_i32_1 = arith.constant 0 : i32
    return %arg0, %c0_i32, %c0_i32_0 : i32, i32, i32
  }
  func.func @transform_1(%arg0: i32, %arg1: i32) -> (i32, i32) {
    %c0_i32 = arith.constant 0 : i32
    %c0_i32_0 = arith.constant 0 : i32
    %c0_i32_1 = arith.constant 0 : i32
    return %c0_i32, %c0_i32_0 : i32, i32
  }
  func.func @transform_2(%arg0: i32, %arg1: i32) -> (i32, i32) {
    %c0_i32 = arith.constant 0 : i32
    %c0_i32_0 = arith.constant 0 : i32
    %c0_i32_1 = arith.constant 0 : i32
    return %c0_i32, %c0_i32_0 : i32, i32
  }
  func.func @transform_3(%arg0: i32, %arg1: i32) -> (i32, i32) {
    %c0_i32 = arith.constant 0 : i32
    %c0_i32_0 = arith.constant 0 : i32
    %c0_i32_1 = arith.constant 0 : i32
    return %c0_i32, %c0_i32_0 : i32, i32
  }
  func.func @transform_4(%arg0: i32, %arg1: i32) -> (i32, i32) {
    %c0_i32 = arith.constant 0 : i32
    %c0_i32_0 = arith.constant 0 : i32
    %c0_i32_1 = arith.constant 0 : i32
    return %c0_i32, %c0_i32_0 : i32, i32
  }
  func.func @transform_5(%arg0: i32, %arg1: i32) -> (i32, i32) {
    %c0_i32 = arith.constant 0 : i32
    %c0_i32_0 = arith.constant 0 : i32
    %c0_i32_1 = arith.constant 0 : i32
    return %c0_i32, %c0_i32_0 : i32, i32
  }
  func.func @transform_6(%arg0: i32, %arg1: i32) -> (i32, i32) {
    %c0_i32 = arith.constant 0 : i32
    %c0_i32_0 = arith.constant 0 : i32
    %c0_i32_1 = arith.constant 0 : i32
    return %c0_i32, %c0_i32_0 : i32, i32
  }
  func.func @transform_7(%arg0: i32, %arg1: i32) -> (i32, i32) {
    %c0_i32 = arith.constant 0 : i32
    %c0_i32_0 = arith.constant 0 : i32
    %c0_i32_1 = arith.constant 0 : i32
    return %c0_i32, %c0_i32_0 : i32, i32
  }
  func.func @transform_8(%arg0: i32, %arg1: i32) -> (i32, i32) {
    %c0_i32 = arith.constant 0 : i32
    %c0_i32_0 = arith.constant 0 : i32
    %c0_i32_1 = arith.constant 0 : i32
    return %c0_i32, %c0_i32_0 : i32, i32
  }
  func.func @transform_9(%arg0: i32, %arg1: i32) -> (i32, i32) {
    %c0_i32 = arith.constant 0 : i32
    %c0_i32_0 = arith.constant 0 : i32
    %c0_i32_1 = arith.constant 0 : i32
    return %c0_i32, %c0_i32_0 : i32, i32
  }
  func.func @transform_10(%arg0: i32, %arg1: i32) -> (i32, i32) {
    %c0_i32 = arith.constant 0 : i32
    %c0_i32_0 = arith.constant 0 : i32
    %c0_i32_1 = arith.constant 0 : i32
    return %c0_i32, %c0_i32_0 : i32, i32
  }
  func.func @transform_11(%arg0: i32, %arg1: i32) -> (i32, i32) {
    %c0_i32 = arith.constant 0 : i32
    %c0_i32_0 = arith.constant 0 : i32
    %c0_i32_1 = arith.constant 0 : i32
    return %c0_i32, %c0_i32_0 : i32, i32
  }
  func.func @transform_12(%arg0: i32, %arg1: i32) -> (i32, i32) {
    %c0_i32 = arith.constant 0 : i32
    %c0_i32_0 = arith.constant 0 : i32
    %c0_i32_1 = arith.constant 0 : i32
    return %c0_i32, %c0_i32_0 : i32, i32
  }
  func.func @transform_13(%arg0: i32, %arg1: i32) -> (i32, i32) {
    %c0_i32 = arith.constant 0 : i32
    %c0_i32_0 = arith.constant 0 : i32
    %c0_i32_1 = arith.constant 0 : i32
    return %c0_i32, %c0_i32_0 : i32, i32
  }
  func.func @transform_14(%arg0: i32, %arg1: i32) -> (i32, i32) {
    %c0_i32 = arith.constant 0 : i32
    %c0_i32_0 = arith.constant 0 : i32
    %c0_i32_1 = arith.constant 0 : i32
    return %c0_i32, %c0_i32_0 : i32, i32
  }
  func.func @transform_15(%arg0: i32, %arg1: i32) -> (i32, i32) {
    %c0_i32 = arith.constant 0 : i32
    %c0_i32_0 = arith.constant 0 : i32
    %c0_i32_1 = arith.constant 0 : i32
    return %c0_i32, %c0_i32_0 : i32, i32
  }
  func.func @transform_16(%arg0: i32, %arg1: i32) -> (i32, i32) {
    %c0_i32 = arith.constant 0 : i32
    %c0_i32_0 = arith.constant 0 : i32
    %c0_i32_1 = arith.constant 0 : i32
    return %c0_i32, %c0_i32_0 : i32, i32
  }
  func.func @transform_17(%arg0: i32, %arg1: i32) -> (i32, i32, i32) {
    %c0_i32 = arith.constant 0 : i32
    %c0_i32_0 = arith.constant 0 : i32
    return %arg0, %arg1, %c0_i32 : i32, i32, i32
  }
  func.func @transform_18(%arg0: i32, %arg1: i32) -> (i32, i32, i32, i32) {
    %c0_i32 = arith.constant 0 : i32
    %c0_i32_0 = arith.constant 0 : i32
    %c0_i32_1 = arith.constant 0 : i32
    return %arg0, %c0_i32, %arg1, %c0_i32_0 : i32, i32, i32, i32
  }
}

</mosaic_0001>

<bundles_post_ra>
// kernel: tpu_custom_call.1
= control target key start
LH: loop header
LB: loop body
LE: loop exit
PB: predicated region body
PF: predicated region fallthrough
CT: control target
= control target key end

     0   :  { %6 = vsyncpa [#allocation3], 0  ;;  %s304_s0 = inlined_call_operand.hbm [shape: f32[8,128], index: 0, kind: input, shape index: {}]   ;;  %s305_s1 = inlined_call_operand.hbm [shape: f32[8,128], index: 1, kind: output, shape index: {}]  }
   0x1   :  { %7 = vsyncpa [#allocation4], 0  ;;  %s257_s6 = smov 0  }
   0x2 LB: > { %s144_s7 = sadd.s32 4294967295, %s243_s6   ;;  %p145_p0 = scmp.ge.s32.totalorder %s243_s6, 1  ;;  %s243_s6 = sphi %s257_s6, %s13_s6  }
   0x3   : > { %p60_p1 = scmp.lt.s32.totalorder %s243_s6, 3  ;;  %p269_p3 = scmp.eq.s32.totalorder %s144_s7, 0 }
   0x4   : > { %s245_s10 = smov [#allocation2]  }
   0x5   : > { %p265_p2 = pnand %p145_p0, %p60_p1  ;;  %s73_s11 = sshll.u32 %s245_s10, 4  ;;  %s74_s11 = int_to_ptr.vmem [resolvable:$true] %s73_s11 }
   0x6   : > { %s190_s12 = scalar_lea.vmem %s74_s11, 128  ;;  %p198_p10 = scmp.lt.s32.totalorder %s74_s11, %s74_s11 }
   0x7   : > { %p161_p4 = pneg %p265_p2  ;;  %p191_p7 = scmp.ne.s32.totalorder %s74_s11, %s190_s12 }
   0x8   : > { %p199_p11 = scmp.lt.s32.totalorder %s190_s12, %s190_s12 }
   0x9   : > { %p162_p5 = pnand %p269_p3, %p161_p4 }
   0xa   : > { %p200_p12 = por %p199_p11, %p198_p10 }
   0xb   : > { %p181_p6 = pneg %p162_p5 }
   0xd   : > { %p193_p8 = pnand %p191_p7, %p181_p6 }
   0xf   : > { %p194_p9 = pneg %p193_p8 }
  0x11   : > { %p201_p13 = pnand %p200_p12, %p194_p9 }
  0x13   : > { %204 = shalt.err (!%p201_p13)
}
  0x14   : > { %164 = dma.hbm_to_vmem [thread:$0]  (!%p162_p5), %s304_s0, 128, %s74_s11, [#allocation3]  }
  0x15   : > { %86 = sbr.rel (%p265_p2) target bundleno = 42 (0x2a), region = 24 }
  0x1a   : > { %234 = dma.done.wait (%p269_p3), [#allocation3], 128  }
  0x1b   : > { %236 = vsyncadd (%p269_p3), [#allocation3], 4294967168  ;;  %s246_s15 = smov [#allocation5]   ;;  %p286_p0 = scmp.eq.s32.totalorder %s144_s7, 1  ;;  %v96_v0 = vld [vmem:[#allocation2] sm:$0xff] }
  0x1c   : > { %s105_s16 = sshll.u32 %s246_s15, 4  ;;  %97 = vst [vmem:[#allocation5] sm:$0xff] %v96_v0  ;;  %s106_s16 = int_to_ptr.vmem [resolvable:$true] %s105_s16 }
  0x1d   : > { %s205_s18 = scalar_lea.vmem %s106_s16, 128  ;;  %p212_p5 = scmp.lt.s32.totalorder %s106_s16, %s106_s16 }
  0x1e   : > { %p206_p1 = scmp.ne.s32.totalorder %s106_s16, %s205_s18  ;;  %p213_p6 = scmp.lt.s32.totalorder %s205_s18, %s205_s18 }
  0x20   : > { %p207_p2 = pnand %p206_p1, %p286_p0  ;;  %p214_p7 = por %p213_p6, %p212_p5 }
  0x22   : > { %p208_p4 = pneg %p207_p2 }
  0x24   : > { %p215_p8 = pnand %p214_p7, %p208_p4 }
  0x26   : > { %218 = shalt.err (!%p215_p8)
}
  0x27   : > { %158 = dma.vmem_to_hbm [thread:$0]  (%p286_p0), %s106_s16, 128, %s305_s1, [#allocation4]  }
  0x28   : > { %238 = dma.done.wait (%p286_p0), [#allocation4], 128  }
  0x29   : > { %240 = vsyncadd (%p286_p0), [#allocation4], 4294967168 }
  0x2a PF: > { %s13_s6 = sadd.s32 1, %s243_s6  }
  0x2b   : > { %p10_p3 = scmp.ge.s32.totalorder %s13_s6, 4  }
  0x2d   :  { %12 = sbr.rel (!%p10_p3) target bundleno = 2 (0x2), region = 53 }
  0x32   :  { %118 = vsyncpa [#allocation3], 1 }
  0x33   :  { %120 = vsyncpa [#allocation3 + $0x1], 1 }
  0x34   :  { %121 = vsyncpa [#allocation4], 1 }
  0x35   :  { %123 = vsyncpa [#allocation4 + $0x1], 1 }

// kernel: tpu_custom_call.1
= control target key start
LH: loop header
LB: loop body
LE: loop exit
PB: predicated region body
PF: predicated region fallthrough
CT: control target
= control target key end

     0   :  { %s3098_s0 = inlined_call_operand.vmem [shape: f32[2,16,32], index: 0, kind: input, shape index: {}]   ;;  %s3099_s1 = inlined_call_operand.vmem [shape: f32[1,32], index: 1, kind: input, shape index: {}]   ;;  %s3100_s2 = inlined_call_operand.vmem [shape: f32[1,32], index: 2, kind: input, shape index: {}]   ;;  %s3101_s3 = inlined_call_operand.vmem [shape: bf16[32,32], index: 3, kind: input, shape index: {}]   ;;  %s3102_s4 = inlined_call_operand.vmem [shape: f32[1,32], index: 4, kind: input, shape index: {}]   ;;  %s3103_s5 = inlined_call_operand.hbm [shape: bf16[32,32], index: 5, kind: input, shape index: {}]   ;;  %s3104_s6 = inlined_call_operand.vmem [shape: f32[1,32], index: 6, kind: input, shape index: {}]   ;;  %s3105_s7 = inlined_call_operand.hbm [shape: bf16[32,32], index: 7, kind: input, shape index: {}]   ;;  %s3106_s8 = inlined_call_operand.vmem [shape: f32[1,32], index: 8, kind: input, shape index: {}]   ;;  %s3107_s9 = inlined_call_operand.hbm [shape: bf16[32,32], index: 9, kind: input, shape index: {}]   ;;  %s3108_s10 = inlined_call_operand.vmem [shape: f32[1,32], index: 10, kind: input, shape index: {}]   ;;  %s3109_s11 = inlined_call_operand.vmem [shape: f32[1,32], index: 11, kind: input, shape index: {}]   ;;  %s3110_s12 = inlined_call_operand.vmem [shape: f32[1,32], index: 12, kind: input, shape index: {}]   ;;  %s3111_s13 = inlined_call_operand.hbm [shape: bf16[32,64], index: 13, kind: input, shape index: {}]   ;;  %s3112_s14 = inlined_call_operand.vmem [shape: f32[1,64], index: 14, kind: input, shape index: {}]   ;;  %s3113_s15 = inlined_call_operand.vmem [shape: bf16[64,32], index: 15, kind: input, shape index: {}]   ;;  %s3114_s16 = inlined_call_operand.vmem [shape: f32[1,32], index: 16, kind: input, shape index: {}]   ;;  %s3115_s17 = inlined_call_operand.hbm [shape: f32[2,16,32], index: 17, kind: output, shape index: {0}]   ;;  %s3116_s18 = inlined_call_operand.hbm [shape: f32[2,4,16,16], index: 18, kind: output, shape index: {1}]  }
   0x1   :  { %3125 = sst [smem:[#allocation26_spill]] %s3098_s0 }
   0x2   :  { %3126 = sst [smem:[#allocation27_spill]] %s3099_s1 }
   0x3   :  { %3127 = sst [smem:[#allocation28_spill]] %s3100_s2 }
   0x4   :  { %3128 = sst [smem:[#allocation29_spill]] %s3105_s7 }
   0x5   :  { %3129 = sst [smem:[#allocation30_spill]] %s3115_s17 }
   0x6   :  { %24 = vsyncpa [#allocation4], 0 }
   0x7   :  { %25 = vsyncpa [#allocation7], 0 }
   0x8   :  { %26 = vsyncpa [#allocation10], 0 }
   0x9   :  { %27 = vsyncpa [#allocation5], 0 }
   0xa   :  { %29 = vsyncpa [#allocation5 + $0x1], 0 }
   0xb   :  { %30 = vsyncpa [#allocation13], 0 }
   0xc   :  { %32 = vsyncpa [#allocation13 + $0x1], 0  ;;  %s2668_s27 = smov 0   ;;  %s2670_s28 = smov 0  }
   0xd   :  { %s2672_s29 = smov 0   ;;  %s2674_s30 = smov 0  }
   0xe   :  { %s2676_s0 = smov 0   ;;  %s2678_s19 = smov 0  }
   0xf LB: > { %3130 = sst [smem:[#allocation19_spill]] %s2534_s27  ;;  %s1936_s1 = sadd.s32 4294967295, %s2554_s19   ;;  %s2554_s19 = sphi %s2678_s19, %s38_s19   ;;  %s2550_s0 = sphi %s2676_s0, %s3153_s0   ;;  %s2546_s30 = sphi %s2674_s30, %s3152_s30   ;;  %s2542_s29 = sphi %s2672_s29, %s3151_s29   ;;  %s2538_s28 = sphi %s2670_s28, %s3155_s28   ;;  %s2534_s27 = sphi %s2668_s27, %s3154_s27  }
  0x10   : > { %3131 = sst [smem:[#allocation20_spill]] %s2542_s29  ;;  %s1937_s20 = sadd.s32 4294967294, %s2554_s19  }
  0x11   : > { %3132 = sst [smem:[#allocation21_spill]] %s2550_s0  ;;  %s50_s21 = sadd.s32 1, %s2550_s0 }
  0x12   : > { %3133 = sst [smem:[#allocation22_spill]] %s2554_s19  ;;  %s421_s22 = sadd.s32 1, %s2542_s29 }
  0x13   : > { %p52_p0 = scmp.ge.s32.totalorder %s50_s21, 2  ;;  %p431_p1 = scmp.ne.s32.totalorder %s2542_s29, %s2538_s28 }
  0x14   : > { %p432_p2 = scmp.eq.s32.totalorder %s1936_s1, 1  ;;  %p437_p3 = scmp.ne.s32.totalorder %s2538_s28, %s2534_s27 }
  0x15   : > { %s3157_s21 = smov (%p52_p0, %s50_s21), 0  ;;  %p438_p5 = scmp.eq.s32.totalorder %s1937_s20, 1 }
  0x16   : > { %3134 = sst [smem:[#allocation23_spill]] %s3157_s21  ;;  %p2708_p4 = por %p432_p2, %p431_p1 }
  0x17   : > { %s416_s23 = ssub.s32 %s2550_s0, %s3157_s21  ;;  %p1938_p6 = scmp.ge.s32.totalorder %s2554_s19, 1 }
  0x18   : > { %p419_p7 = scmp.eq.s32.totalorder %s416_s23, 0  ;;  %p2715_p8 = por %p438_p5, %p437_p3 }
  0x19   : > { %p473_p9 = scmp.lt.s32.totalorder %s2554_s19, 3  ;;  %p2727_p11 = scmp.eq.s32.totalorder %s1936_s1, 0 }
  0x1a   : > { %s3136_s24 = scalar_select %p2715_p8, 1, 0 }
  0x1b   : > { %s2721_s25 = scalar_select %p419_p7, %s2542_s29, %s421_s22  }
  0x1c   : > { %3137 = sst [smem:[#allocation24_spill]] %s3136_s24  ;;  %p2723_p10 = pnand %p1938_p6, %p473_p9 }
  0x1d   : > { %3138 = sst [smem:[#allocation25_spill]] %s2721_s25  ;;  %s2556_s20 = smov [#allocation6]  }
  0x1e   : > { %p2181_p12 = pneg %p2723_p10  ;;  %s513_s23 = sshll.u32 %s2556_s20, 4  ;;  %s514_s23 = int_to_ptr.vmem [resolvable:$true] %s513_s23 }
  0x1f   : > { %s2557_s22 = smov [#allocation3]   ;;  %s2343_s1 = scalar_lea.vmem %s514_s23, 256 }
  0x20   : > { %p2735_p13 = pnand %p2727_p11, %p2181_p12  ;;  %s497_s0 = sshll.u32 %s2557_s22, 4  ;;  %s498_s0 = int_to_ptr.vmem [resolvable:$true] %s497_s0 }
  0x21   : > { %p2344_p1 = scmp.ne.s32.totalorder %s514_s23, %s2343_s1  ;;  %p2351_p5 = scmp.lt.s32.totalorder %s514_s23, %s514_s23 }
  0x22   : > { %p2334_p0 = pneg %p2735_p13  ;;  %p2352_p6 = scmp.lt.s32.totalorder %s2343_s1, %s2343_s1 }
  0x24   : > { %p2346_p2 = pnand %p2344_p1, %p2334_p0  ;;  %p2353_p7 = por %p2352_p6, %p2351_p5 }
  0x26   : > { %p2347_p3 = pneg %p2346_p2 }
  0x28   : > { %p2354_p9 = pnand %p2353_p7, %p2347_p3 }
  0x2a   : > { %2357 = shalt.err (!%p2354_p9)
}
  0x2b   : > { %s2558_s20 = smov 64   ;;  %s2559_s25 = smov 4  }
  0x2c   : > { %s3142_s7 = sld [smem:[#allocation29_spill]]  ;;  %s2369_s24 = scalar_lea.vmem %s498_s0, 256 }
  0x2d   : > { %p2370_p12 = scmp.ne.s32.totalorder %s498_s0, %s2369_s24  ;;  %p2377_p3 = scmp.lt.s32.totalorder %s498_s0, %s498_s0 }
  0x2e   : > { %p2378_p5 = scmp.lt.s32.totalorder %s2369_s24, %s2369_s24 }
  0x2f   : > { %p2372_p1 = pnand %p2370_p12, %p2334_p0 }
  0x30   : > { %p2379_p6 = por %p2378_p5, %p2377_p3 }
  0x31   : > { %p2373_p2 = pneg %p2372_p1 }
  0x32   : > { %2187 = dma.hbm_to_vmem [thread:$0]  (!%p2735_p13), %s3142_s7, 256, %s514_s23, [#allocation7], %s2558_s20, %s2558_s20, %s2559_s25  }
  0x33   : > { %p2380_p7 = pnand %p2379_p6, %p2373_p2 }
  0x35   : > { %2383 = shalt.err (!%p2380_p7)
}
  0x36   : > { %2184 = dma.hbm_to_vmem [thread:$0]  (!%p2735_p13), %s3103_s5, 256, %s498_s0, [#allocation4], %s2558_s20, %s2558_s20, %s2559_s25  }
  0x37   : > { %s2560_s23 = smov [#allocation8]   ;;  %s2561_s7 = smov [#allocation9]  }
  0x38   : > { %s529_s22 = sshll.u32 %s2560_s23, 4  ;;  %s551_s19 = sshll.u32 %s2561_s7, 4  ;;  %s530_s22 = int_to_ptr.vmem [resolvable:$true] %s529_s22  ;;  %s552_s19 = int_to_ptr.vmem [resolvable:$true] %s551_s19 }
  0x39   : > { %s2395_s17 = scalar_lea.vmem %s530_s22, 256  ;;  %p2403_p2 = scmp.lt.s32.totalorder %s530_s22, %s530_s22 }
  0x3a   : > { %p2396_p9 = scmp.ne.s32.totalorder %s530_s22, %s2395_s17  ;;  %p2404_p3 = scmp.lt.s32.totalorder %s2395_s17, %s2395_s17 }
  0x3c   : > { %p2398_p12 = pnand %p2396_p9, %p2334_p0  ;;  %p2405_p5 = por %p2404_p3, %p2403_p2 }
  0x3e   : > { %p2399_p1 = pneg %p2398_p12 }
  0x40   : > { %p2406_p6 = pnand %p2405_p5, %p2399_p1 }
  0x42   : > { %2409 = shalt.err (!%p2406_p6)
}
  0x43   : > { %2190 = dma.hbm_to_vmem [thread:$0]  (!%p2735_p13), %s3107_s9, 256, %s530_s22, [#allocation7], %s2558_s20, %s2558_s20, %s2559_s25  }
  0x44   : > { %s2421_s7 = scalar_lea.vmem %s552_s19, 256  ;;  %p2429_p2 = scmp.lt.s32.totalorder %s552_s19, %s552_s19 }
  0x45   : > { %p2422_p7 = scmp.ne.s32.totalorder %s552_s19, %s2421_s7  ;;  %p2430_p1 = scmp.lt.s32.totalorder %s2421_s7, %s2421_s7 }
  0x47   : > { %p2424_p9 = pnand %p2422_p7, %p2334_p0  ;;  %p2431_p3 = por %p2430_p1, %p2429_p2 }
  0x49   : > { %p2425_p12 = pneg %p2424_p9 }
  0x4b   : > { %p2432_p5 = pnand %p2431_p3, %p2425_p12 }
  0x4d   : > { %2435 = shalt.err (!%p2432_p5)
}
  0x4e   : > { %2193 = dma.hbm_to_vmem [thread:$0]  (!%p2735_p13), %s3111_s13, 256, %s552_s19, [#allocation10], %s2558_s20, %s2558_s20, %s2559_s25  }
  0x4f   : > { %584 = sbr.rel (%p2723_p10) target bundleno = 2575 (0xa0f), region = 88 }
  0x54   : > { %2513 = dma.done.wait (%p2727_p11), [#allocation4], 256  }
  0x55   : > { %2515 = vsyncadd (%p2727_p11), [#allocation4], 4294967040 }
  0x56   : > { %2517 = dma.done.wait (%p2727_p11), [#allocation7], 512  }
  0x57   : > { %2519 = vsyncadd (%p2727_p11), [#allocation7], 4294966784 }
  0x58   : > { %2521 = dma.done.wait (%p2727_p11), [#allocation10], 256  }
  0x59   : > { %2523 = vsyncadd (%p2727_p11), [#allocation10], 4294967040  ;;  %p655_p10 = scmp.lt.s32.totalorder %s2546_s30, 1  ;;  %s3143_s20 = sld [smem:[#allocation26_spill]]  ;;  %vm667_vm0 = vcmask 261120   ;;  %v2273_v14 = vld [vmem:[%s3101_s3 + $0x8] sm:$0xff]  }
  0x5a   : > { %v2274_v15 = vld [vmem:[#allocation3 + $0x8] sm:$0xff]   ;;  %v2562_v16 = vmov 0.0   ;;  %v2275_v17 = vld [vmem:[%s3101_s3] sm:$0xff]   ;;  %v2276_v18 = vld [vmem:[#allocation3] sm:$0xff]   ;;  %vm2563_vm1 = vmmov 0   ;;  %s3144_s17 = sld [smem:[#allocation27_spill]] }
  0x5b   : > { %s656_s19 = scalar_select %p655_p10, %s2546_s30, 1  ;;  %2061 = vmatprep.subr.bf16.mxu0 %v2562_v16  ;;  %2069 = vmatprep.subr.bf16.mxu1 %v2562_v16  ;;  %v2277_v35 = vld [vmem:[#allocation6 + $0x8] sm:$0xff]   ;;  %v2278_v37 = vld [vmem:[#allocation6] sm:$0xff]   ;;  %vm912_vm2 = vcmask 64512   ;;  %vm960_vm3 = vcmask 130048   ;;  %vm1038_vm4 = vcmask 60416  }
  0x5c   : > { %2062 = vmatpush3.bf16.msra.mxu0 %v2273_v14  ;;  %2070 = vmatpush3.bf16.msra.mxu1 %v2274_v15  ;;  %v1955_v38 = vld [vmem:[%s3102_s4] ss:$0 sm:$0xff]  ;;  %s2564_s27 = smov 120   ;;  %s2565_s0 = smov 104   ;;  %vm1180_vm5 = vcmask 126016   ;;  %vm1319_vm6 = vcmask 191616  }
  0x5d   : > { %s2014_s21 = sshll.u32 %s656_s19, 4  ;;  %2063 = vmatprep.subr.bf16.mxu0 %v2562_v16  ;;  %2071 = vmatprep.subr.bf16.mxu1 %v2562_v16  ;;  %v1959_v41 = vld [vmem:[%s3104_s6] ss:$0 sm:$0xff]  ;;  %s2566_s24 = smov 112   ;;  %vm1458_vm7 = vcmask 257216   ;;  %vm1699_vm8 = vcmask 523264  }
  0x5e   : > { %2065 = vmatprep.mubr.msk.bf16.mxu0 %vm2563_vm1, %v2562_v16  ;;  %2073 = vmatprep.mubr.msk.bf16.mxu1 %vm2563_vm1, %v2562_v16  ;;  %v1963_v58 = vld [vmem:[%s3106_s8] ss:$0 sm:$0xff]  ;;  %s2909_s7 = sand.u32 1, %s2538_s28   ;;  %s2567_s19 = smov 8  }
  0x5f   : > { %s659_s29 = scalar_lea.vmem %s3143_s20, %s2014_s21  ;;  %s3145_s21 = sld [smem:[#allocation28_spill]] }
  0x60   : > { %v2804_v0 = vld [vmem:[%s659_s29] sm:$0xff]  ;;  %v2806_v1 = vld [vmem:[%s659_s29 + $0x8] sm:$0xff]  ;;  %2064 = vmatpush3.bf16.msra.mxu0 %v2275_v17  ;;  %2072 = vmatpush3.bf16.msra.mxu1 %v2276_v18  ;;  %s2569_s25 = smov 24   ;;  %s2570_s20 = smov [#allocation12]  }
  0x61   : > { %v668_v2 = vsel %vm667_vm0, %v2804_v0, 0.0  ;;  %v671_v3 = vsel %vm667_vm0, %v2806_v1, 0.0  ;;  %2077 = vmatprep.subr.bf16.mxu0 %v2562_v16  ;;  %2085 = vmatprep.subr.bf16.mxu1 %v2562_v16  ;;  %v1953_v27 = vld [vmem:[%s3144_s17] ss:$0 sm:$0xff]  ;;  %s1950_s17 = sshll.u32 %s2909_s7, 6  ;;  %s2440_s29 = sshll.u32 %s2570_s20, 4  ;;  %s2441_s29 = int_to_ptr.vmem [resolvable:$false] %s2440_s29 }
  0x62   : > { %669 = vadd.xlane.f32.xlu0 %v668_v2  ;;  %s2914_s1 = scalar_lea.vmem [#allocation12], %s1950_s17 }
  0x63   : > { %s1787_s22 = sshll.u32 %s2914_s1, 4  ;;  %s3002_s22 = int_to_ptr.vmem [resolvable:$true] %s1787_s22 }
  0x64   : > { %s2436_s26 = scalar_lea.vmem %s3002_s22, 1024  ;;  %p2443_p6 = scmp.lt.s32.totalorder %s3002_s22, %s2441_s29 }
  0x65   : > { %v1954_v31 = vld [vmem:[%s3145_s21] ss:$0 sm:$0xff]  ;;  %s2568_s21 = smov 16   ;;  %p2437_p11 = scmp.ne.s32.totalorder %s3002_s22, %s2436_s26 }
  0x66   : > { %672 = vadd.xlane.f32.xlu0 %v671_v3 }
  0x67   : > { %p2438_p13 = pnand %p2437_p11, %p2708_p4 }
  0x69   : > { %p2439_p0 = pneg %p2438_p13 }
  0xeb   : > { %v670_v4 = vpop.xlane.xlu0 %669 }
  0xec   : > { %v675_v5 = vmul.f32 0.03125, %v670_v4 }
  0xee   : > { %v677_v6 = vsub.f32 %v2804_v0, %v675_v5 }
  0xef   : > { %v673_v7 = vpop.xlane.xlu0 %672 }
  0xf0   : > { %v676_v8 = vmul.f32 0.03125, %v673_v7  ;;  %v679_v9 = vmul.f32 %v677_v6, %v677_v6 }
  0xf2   : > { %v678_v10 = vsub.f32 %v2806_v1, %v676_v8  ;;  %v681_v11 = vsel %vm667_vm0, %v679_v9, 0.0 }
  0xf3   : > { %682 = vadd.xlane.f32.xlu1 %v681_v11 }
  0xf4   : > { %v680_v12 = vmul.f32 %v678_v10, %v678_v10 }
  0xf6   : > { %v684_v13 = vsel %vm667_vm0, %v680_v12, 0.0 }
  0xf7   : > { %685 = vadd.xlane.f32.xlu1 %v684_v13 }
 0x17c   : > { %v683_v19 = vpop.xlane.xlu1 %682 }
 0x17d   : > { %v687_v20 = vmul.f32 0.03125, %v683_v19 }
 0x17f   : > { %v689_v21 = vadd.f32 1e-06, %v687_v20 }
 0x180   : > { %v686_v22 = vpop.xlane.xlu1 %685 }
 0x181   : > { %2288 = vrsqrt.f32 %v689_v21  ;;  %v688_v23 = vmul.f32 0.03125, %v686_v22 }
 0x183   : > { %v690_v24 = vadd.f32 1e-06, %v688_v23 }
 0x185   : > { %2290 = vrsqrt.f32 %v690_v24 }
 0x18e   : > { %v2289_v25 = vpop.eup %2288 }
 0x18f   : > { %v693_v26 = vmul.f32 %v2289_v25, %v677_v6 }
 0x191   : > { %v701_v30 = vmul.f32 %v1953_v27, %v693_v26 }
 0x192   : > { %v2291_v28 = vpop.eup %2290 }
 0x193   : > { %v694_v29 = vmul.f32 %v2291_v28, %v678_v10  ;;  %v709_v33 = vadd.f32 %v1954_v31, %v701_v30 }
 0x195   : > { %v702_v32 = vmul.f32 %v1953_v27, %v694_v29 }
 0x197   : > { %v710_v34 = vadd.f32 %v1954_v31, %v702_v32 }
 0x199   : > { %v711_v36 = vpack.c.bf16 %v710_v34, %v709_v33 }
 0x19b   : > { %2066 = vmatmul.mubr.msk.bf16.vlgmr.msra.gmra.mxu0 %vm667_vm0, %v711_v36  ;;  %2074 = vmatmul.mubr.msk.bf16.vlgmr.msra.gmra.mxu1 %vm667_vm0, %v711_v36 }
 0x19c   : > { %2078 = vmatpush3.bf16.msra.mxu0 %v2277_v35  ;;  %2081 = vmatprep.mubr.msk.bf16.mxu0 %vm2563_vm1, %v2562_v16 }
 0x19d   : > { %2079 = vmatprep.subr.bf16.mxu0 %v2562_v16  ;;  %2087 = vmatprep.mubr.msk.bf16.mxu1 %vm2563_vm1, %v2562_v16 }
 0x1a0   : > { %2080 = vmatpush3.bf16.msra.mxu0 %v2278_v37 }
 0x1a1   : > { %2091 = vmatprep.subr.bf16.mxu0 %v2562_v16 }
 0x1a3   : > { %2082 = vmatmul.mubr.msk.bf16.vlgmr.msra.gmra.mxu0 %vm667_vm0, %v711_v36 }
 0x1a4   : > { %2093 = vmatprep.mubr.msk.bf16.mxu0 %vm2563_vm1, %v2562_v16 }
 0x25b   : > { %v772_v39 = vpop.f32.mrf.mxu0  ;;  %v836_v40 = vpop.f32.mrf.mxu1 }
 0x25c   : > { %v773_v44 = vadd.f32 %v1955_v38, %v772_v39  ;;  %v837_v47 = vadd.f32 %v1959_v41, %v836_v40 }
 0x25d   : > { %v2067_v42 = vpop.f32.mrf.mxu0  ;;  %v2075_v43 = vpop.f32.mrf.mxu1 }
 0x25e   : > { %v907_v52 = vmul.f32 0.35355338, %v773_v44 }
 0x25f   : > { %v775_v45 = vpop.f32.mrf.mxu0  ;;  %v839_v46 = vpop.f32.mrf.mxu1 }
 0x260   : > { %v776_v48 = vadd.f32 %v1955_v38, %v775_v45  ;;  %v840_v49 = vadd.f32 %v1959_v41, %v839_v46 }
 0x261   : > { %v2068_v50 = vpop.f32.mrf.mxu0  ;;  %v2076_v51 = vpop.f32.mrf.mxu1 }
 0x262   : > { %v908_v53 = vmul.f32 0.35355338, %v776_v48  ;;  %v910_v54 = vpack.c.bf16 %v840_v49, %v837_v47 }
 0x263   : > { %v900_v55 = vpop.f32.mrf.mxu0 }
 0x264   : > { %v909_v56 = vpack.c.bf16 %v908_v53, %v907_v52  ;;  %1045 = vrot.lane.b32.xlu0 %v910_v54, %s2564_s27  ;;  %v917_v57 = vsel %vm912_vm2, %v910_v54, 0  ;;  %v901_v61 = vadd.f32 %v1963_v58, %v900_v55 }
 0x265   : > { %v2083_v59 = vpop.f32.mrf.mxu0  ;;  %2086 = vmatpush3.bf16.xpose.msra.mxu1 %v917_v57 }
 0x266   : > { %1042 = vrot.lane.b32.xlu1 %v909_v56, %s2564_s27  ;;  %2097 = vmatprep.subr.bf16.mxu1 %v2562_v16 }
 0x267   : > { %v903_v60 = vpop.f32.mrf.mxu0 }
 0x268   : > { %v904_v62 = vadd.f32 %v1963_v58, %v903_v60  ;;  %1324 = vrot.lane.b32.xlu0 %v910_v54, %s2565_s0 }
 0x269   : > { %v2084_v63 = vpop.f32.mrf.mxu0 }
 0x26a   : > { %v2863_v2 = vpack.c.bf16 %v904_v62, %v901_v61  ;;  %1185 = vrot.lane.b32.xlu1 %v910_v54, %s2566_s24 }
 0x26c   : > { %2088 = vmatmul.mubr.msk.bf16.vlgmr.msra.gmra.mxu1 %vm912_vm2, %v909_v56  ;;  %2092 = vmatpush3.bf16.msra.mxu0 %v2863_v2 }
 0x26d   : > { %2099 = vmatprep.mubr.msk.bf16.mxu1 %vm2563_vm1, %v2562_v16  ;;  %2103 = vmatprep.subr.bf16.mxu0 %v2562_v16 }
 0x26e   : > { %1183 = vrot.lane.b32.xlu1 %v909_v56, %s2566_s24 }
 0x272   : > { %1322 = vrot.lane.b32.xlu1 %v909_v56, %s2565_s0 }
 0x2d6   : > { %v1046_v3 = vpop.permute.xlu0 %1045 }
 0x2d7   : > { %v1051_v4 = vsel %vm912_vm2, %v1046_v3, 0 }
 0x2d8   : > { %v1043_v5 = vpop.permute.xlu1 %1042  ;;  %2098 = vmatpush3.bf16.xpose.msra.mxu1 %v1051_v4 }
 0x2d9   : > { %2109 = vmatprep.subr.bf16.mxu1 %v2562_v16 }
 0x2da   : > { %v1325_v8 = vpop.permute.xlu0 %1324 }
 0x2db   : > { %v1330_v10 = vsel %vm912_vm2, %v1325_v8, 0 }
 0x2dc   : > { %v1186_v6 = vpop.permute.xlu1 %1185 }
 0x2dd   : > { %v1191_v7 = vsel %vm912_vm2, %v1186_v6, 0 }
 0x2df   : > { %2100 = vmatmul.mubr.msk.bf16.vlgmr.msra.gmra.mxu1 %vm912_vm2, %v1043_v5 }
 0x2e0   : > { %2110 = vmatpush3.bf16.xpose.msra.mxu1 %v1191_v7  ;;  %2111 = vmatprep.mubr.msk.bf16.mxu1 %vm2563_vm1, %v2562_v16  ;;  %v1184_v9 = vpop.permute.xlu1 %1183 }
 0x2e1   : > { %2121 = vmatprep.subr.bf16.mxu1 %v2562_v16 }
 0x2e4   : > { %v1323_v11 = vpop.permute.xlu1 %1322 }
 0x2e7   : > { %2112 = vmatmul.mubr.msk.bf16.vlgmr.msra.gmra.mxu1 %vm912_vm2, %v1184_v9 }
 0x2e8   : > { %2122 = vmatpush3.bf16.xpose.msra.mxu1 %v1330_v10  ;;  %2123 = vmatprep.mubr.msk.bf16.mxu1 %vm2563_vm1, %v2562_v16 }
 0x2e9   : > { %2133 = vmatprep.subr.bf16.mxu1 %v2562_v16 }
 0x2ef   : > { %2124 = vmatmul.mubr.msk.bf16.vlgmr.msra.gmra.mxu1 %vm912_vm2, %v1323_v11 }
 0x2f0   : > { %2137 = vmatprep.mubr.msk.bf16.mxu1 %vm2563_vm1, %v2562_v16 }
 0x32c   : > { %v953_v12 = vpop.f32.mrf.mxu1 }
 0x32d   : > { %v961_v13 = vsel %vm960_vm3, %v953_v12, -inf }
 0x32e   : > { %962 = vmax.xlane.f32.xlu0 %v961_v13  ;;  %v2089_v14 = vpop.f32.mrf.mxu1 }
 0x330   : > { %v956_v15 = vpop.f32.mrf.mxu1 }
 0x331   : > { %v964_v17 = vsel %vm960_vm3, %v956_v15, -inf }
 0x332   : > { %965 = vmax.xlane.f32.xlu1 %v964_v17  ;;  %v2090_v18 = vpop.f32.mrf.mxu1 }
 0x39f   : > { %v1087_v19 = vpop.f32.mrf.mxu1 }
 0x3a0   : > { %v1094_v20 = vsel %vm960_vm3, %v1087_v19, -inf }
 0x3a1   : > { %1095 = vmax.xlane.f32.xlu0 %v1094_v20  ;;  %v2101_v21 = vpop.f32.mrf.mxu1 }
 0x3a3   : > { %v1090_v22 = vpop.f32.mrf.mxu1 }
 0x3a4   : > { %v1097_v23 = vsel %vm960_vm3, %v1090_v22, -inf }
 0x3a5   : > { %1098 = vmax.xlane.f32.xlu0 %v1097_v23  ;;  %v2102_v24 = vpop.f32.mrf.mxu1 }
 0x3a7   : > { %v1227_v25 = vpop.f32.mrf.mxu1 }
 0x3a8   : > { %v1234_v26 = vsel %vm960_vm3, %v1227_v25, -inf }
 0x3a9   : > { %1235 = vmax.xlane.f32.xlu0 %v1234_v26  ;;  %v2113_v27 = vpop.f32.mrf.mxu1 }
 0x3ab   : > { %v1230_v28 = vpop.f32.mrf.mxu1 }
 0x3ac   : > { %v1237_v29 = vsel %vm960_vm3, %v1230_v28, -inf }
 0x3ad   : > { %1238 = vmax.xlane.f32.xlu1 %v1237_v29  ;;  %v2114_v30 = vpop.f32.mrf.mxu1 }
 0x3af   : > { %v1366_v31 = vpop.f32.mrf.mxu1 }
 0x3b0   : > { %v1373_v32 = vsel %vm960_vm3, %v1366_v31, -inf }
 0x3b1   : > { %1374 = vmax.xlane.f32.xlu0 %v1373_v32  ;;  %v2125_v33 = vpop.f32.mrf.mxu1 }
 0x3b3   : > { %v2895_v34 = vpop.f32.mrf.mxu1 }
 0x3b4   : > { %v1376_v35 = vsel %vm960_vm3, %v2895_v34, -inf }
 0x3b5   : > { %1377 = vmax.xlane.f32.xlu1 %v1376_v35  ;;  %v2126_v36 = vpop.f32.mrf.mxu1 }
 0x3b7   : > { %v963_v37 = vpop.xlane.xlu0 %962 }
 0x3b8   : > { %v967_v38 = vsub.f32 %v953_v12, %v963_v37 }
 0x3ba   : > { %v969_v39 = vmul.f32 1.442695, %v967_v38 }
 0x3bb   : > { %v966_v40 = vpop.xlane.xlu1 %965 }
 0x3bc   : > { %2292 = vpow2.f32 %v969_v39  ;;  %v968_v41 = vsub.f32 %v956_v15, %v966_v40 }
 0x3be   : > { %v971_v42 = vmul.f32 1.442695, %v968_v41 }
 0x3c0   : > { %2294 = vpow2.f32 %v971_v42 }
 0x3c9   : > { %v2293_v43 = vpop.eup %2292 }
 0x3ca   : > { %v973_v44 = vsel %vm960_vm3, %v2293_v43, 0.0 }
 0x3cb   : > { %974 = vadd.xlane.f32.xlu0 %v973_v44 }
 0x3cd   : > { %v2295_v45 = vpop.eup %2294 }
 0x3ce   : > { %v976_v46 = vsel %vm960_vm3, %v2295_v45, 0.0 }
 0x3cf   : > { %977 = vadd.xlane.f32.xlu1 %v976_v46 }
 0x42a   : > { %v1096_v47 = vpop.xlane.xlu0 %1095 }
 0x42b   : > { %v1100_v48 = vsub.f32 %v1087_v19, %v1096_v47 }
 0x42d   : > { %v1102_v49 = vmul.f32 1.442695, %v1100_v48 }
 0x42e   : > { %v1099_v50 = vpop.xlane.xlu0 %1098 }
 0x42f   : > { %2296 = vpow2.f32 %v1102_v49  ;;  %v1101_v51 = vsub.f32 %v1090_v22, %v1099_v50 }
 0x431   : > { %v1104_v52 = vmul.f32 1.442695, %v1101_v51 }
 0x432   : > { %v1236_v53 = vpop.xlane.xlu0 %1235 }
 0x433   : > { %2298 = vpow2.f32 %v1104_v52  ;;  %v1240_v54 = vsub.f32 %v1227_v25, %v1236_v53 }
 0x435   : > { %v1242_v55 = vmul.f32 1.442695, %v1240_v54 }
 0x436   : > { %v1239_v56 = vpop.xlane.xlu1 %1238 }
 0x437   : > { %2300 = vpow2.f32 %v1242_v55  ;;  %v1241_v57 = vsub.f32 %v1230_v28, %v1239_v56 }
 0x439   : > { %v1244_v58 = vmul.f32 1.442695, %v1241_v57 }
 0x43a   : > { %v1375_v59 = vpop.xlane.xlu0 %1374 }
 0x43b   : > { %2302 = vpow2.f32 %v1244_v58  ;;  %v1379_v60 = vsub.f32 %v1366_v31, %v1375_v59 }
 0x43c   : > { %v2297_v61 = vpop.eup %2296 }
 0x43d   : > { %v1381_v62 = vmul.f32 1.442695, %v1379_v60  ;;  %v1106_v63 = vsel %vm960_vm3, %v2297_v61, 0.0 }
 0x43e   : > { %1107 = vadd.xlane.f32.xlu0 %v1106_v63  ;;  %v1378_v11 = vpop.xlane.xlu1 %1377 }
 0x43f   : > { %2304 = vpow2.f32 %v1381_v62  ;;  %v1380_v18 = vsub.f32 %v2895_v34, %v1378_v11 }
 0x440   : > { %v2299_v3 = vpop.eup %2298 }
 0x441   : > { %v1109_v4 = vsel %vm960_vm3, %v2299_v3, 0.0  ;;  %v1383_v21 = vmul.f32 1.442695, %v1380_v18 }
 0x442   : > { %1110 = vadd.xlane.f32.xlu1 %v1109_v4  ;;  %v2279_v4 = vld [vmem:[#allocation8 + $0x8] sm:$0xff]  }
 0x443   : > { %2134 = vmatpush3.bf16.msra.mxu1 %v2279_v4 }
 0x444   : > { %v2301_v5 = vpop.eup %2300  ;;  %2135 = vmatprep.subr.bf16.mxu1 %v2562_v16 }
 0x445   : > { %v1246_v6 = vsel %vm960_vm3, %v2301_v5, 0.0 }
 0x446   : > { %1247 = vadd.xlane.f32.xlu0 %v1246_v6 }
 0x448   : > { %v2303_v7 = vpop.eup %2302 }
 0x449   : > { %v1249_v8 = vsel %vm960_vm3, %v2303_v7, 0.0 }
 0x44a   : > { %1250 = vadd.xlane.f32.xlu1 %v1249_v8 }
 0x44c   : > { %v2305_v9 = vpop.eup %2304 }
 0x44d   : > { %v1385_v10 = vsel %vm960_vm3, %v2305_v9, 0.0 }
 0x44e   : > { %1386 = vadd.xlane.f32.xlu0 %v1385_v10 }
 0x454   : > { %v975_v12 = vpop.xlane.xlu0 %974 }
 0x455   : > { %2306 = vrcp.f32 %v975_v12 }
 0x458   : > { %v978_v13 = vpop.xlane.xlu1 %977 }
 0x459   : > { %2308 = vrcp.f32 %v978_v13 }
 0x45a   : > { %2310 = vpow2.f32 %v1383_v21 }
 0x45b   : > { %1260 = vrot.lane.b32.xlu1 %v2863_v2, %s2566_s24 }
 0x462   : > { %v2307_v14 = vpop.eup %2306 }
 0x463   : > { %v981_v15 = vmul.f32 %v2307_v14, %v2293_v43 }
 0x464   : > { %1121 = vrot.lane.b32.xlu0 %v2863_v2, %s2564_s27 }
 0x465   : > { %983 = vst.msk [vmem:[%s2914_s1] sm:$0xff] %vm960_vm3, %v981_v15 }
 0x466   : > { %v2309_v17 = vpop.eup %2308 }
 0x467   : > { %v982_v19 = vmul.f32 %v2309_v17, %v2295_v45  ;;  %v2311_v22 = vpop.eup %2310 }
 0x468   : > { %v1388_v23 = vsel %vm960_vm3, %v2311_v22, 0.0 }
 0x469   : > { %v985_v20 = vpack.c.bf16 %v982_v19, %v981_v15  ;;  %984 = vst.msk [vmem:[%s2914_s1 + $0x8] sm:$0xff] %vm960_vm3, %v982_v19 }
 0x46b   : > { %2094 = vmatmul.mubr.msk.bf16.vlgmr.msra.gmra.mxu0 %vm960_vm3, %v985_v20  ;;  %v1989_v20 = vld [vmem:[%s3108_s10] ss:$0 sm:$0xff] }
 0x46c   : > { %2105 = vmatprep.mubr.msk.bf16.mxu0 %vm2563_vm1, %v2562_v16 }
 0x47f   : > { %1389 = vadd.xlane.f32.xlu1 %v1388_v23 }
 0x490   : > { %1399 = vrot.lane.b32.xlu1 %v2863_v2, %s2565_s0  ;;  %s2024_s0 = sshll.u32 %s2546_s30, 10 }
 0x4c7   : > { %v1108_v24 = vpop.xlane.xlu0 %1107 }
 0x4c8   : > { %2312 = vrcp.f32 %v1108_v24 }
 0x4cb   : > { %v1111_v25 = vpop.xlane.xlu1 %1110 }
 0x4cc   : > { %2314 = vrcp.f32 %v1111_v25 }
 0x4cf   : > { %v1248_v26 = vpop.xlane.xlu0 %1247 }
 0x4d0   : > { %2316 = vrcp.f32 %v1248_v26 }
 0x4d3   : > { %v1251_v27 = vpop.xlane.xlu1 %1250 }
 0x4d4   : > { %2318 = vrcp.f32 %v1251_v27 }
 0x4d5   : > { %v2313_v28 = vpop.eup %2312 }
 0x4d6   : > { %v1114_v29 = vmul.f32 %v2313_v28, %v2297_v61 }
 0x4d7   : > { %v1387_v30 = vpop.xlane.xlu0 %1386  ;;  %v1261_v36 = vpop.permute.xlu1 %1260 }
 0x4d8   : > { %2320 = vrcp.f32 %v1387_v30  ;;  %1972 = vst.msk [vmem:[%s2914_s1 + $0x10] sm:$0xff] %vm960_vm3, %v1114_v29 }
 0x4d9   : > { %v2315_v31 = vpop.eup %2314 }
 0x4da   : > { %v1115_v32 = vmul.f32 %v2315_v31, %v2299_v3 }
 0x4db   : > { %v1122_v33 = vpop.permute.xlu0 %1121 }
 0x4dc   : > { %2104 = vmatpush3.bf16.msra.mxu0 %v1122_v33  ;;  %v1119_v2 = vpack.c.bf16 %v1115_v32, %v1114_v29  ;;  %1973 = vst.msk [vmem:[%s2914_s1 + $0x18] sm:$0xff] %vm960_vm3, %v1115_v32 }
 0x4dd   : > { %v2317_v34 = vpop.eup %2316  ;;  %2115 = vmatprep.subr.bf16.mxu0 %v2562_v16 }
 0x4de   : > { %v1254_v35 = vmul.f32 %v2317_v34, %v2301_v5  ;;  %v2280_v5 = vld [vmem:[#allocation8] sm:$0xff]  }
 0x4df   : > { %2106 = vmatmul.mubr.msk.bf16.vlgmr.msra.gmra.mxu0 %vm960_vm3, %v1119_v2  ;;  %2136 = vmatpush3.bf16.msra.mxu1 %v2280_v5 }
 0x4e0   : > { %2116 = vmatpush3.bf16.msra.mxu0 %v1261_v36  ;;  %2117 = vmatprep.mubr.msk.bf16.mxu0 %vm2563_vm1, %v2562_v16  ;;  %1978 = vst.msk [vmem:[%s2914_s1 + $0x20] sm:$0xff] %vm960_vm3, %v1254_v35 }
 0x4e1   : > { %v2319_v37 = vpop.eup %2318  ;;  %2127 = vmatprep.subr.bf16.mxu0 %v2562_v16  ;;  %2149 = vmatprep.subr.bf16.mxu1 %v2562_v16 }
 0x4e2   : > { %v1255_v38 = vmul.f32 %v2319_v37, %v2303_v7 }
 0x4e4   : > { %v1259_v39 = vpack.c.bf16 %v1255_v38, %v1254_v35  ;;  %1979 = vst.msk [vmem:[%s2914_s1 + $0x28] sm:$0xff] %vm960_vm3, %v1255_v38  ;;  %v2282_v38 = vld [vmem:[#allocation9 + $0x8] sm:$0xff]  }
 0x4e5   : > { %v2321_v40 = vpop.eup %2320 }
 0x4e6   : > { %v1393_v41 = vmul.f32 %v2321_v40, %v2305_v9 }
 0x4e7   : > { %2118 = vmatmul.mubr.msk.bf16.vlgmr.msra.gmra.mxu0 %vm960_vm3, %v1259_v39  ;;  %v2283_v39 = vld [vmem:[#allocation9] sm:$0xff]  }
 0x4e8   : > { %2129 = vmatprep.mubr.msk.bf16.mxu0 %vm2563_vm1, %v2562_v16  ;;  %1984 = vst.msk [vmem:[%s2914_s1 + $0x30] sm:$0xff] %vm960_vm3, %v1393_v41 }
 0x508   : > { %v1390_v42 = vpop.xlane.xlu1 %1389 }
 0x509   : > { %2322 = vrcp.f32 %v1390_v42 }
 0x50c   : > { %v1400_v43 = vpop.permute.xlu1 %1399 }
 0x50d   : > { %2128 = vmatpush3.bf16.msra.mxu0 %v1400_v43 }
 0x50e   : > { %2141 = vmatprep.subr.bf16.mxu0 %v2562_v16 }
 0x516   : > { %v2323_v44 = vpop.eup %2322 }
 0x517   : > { %v1394_v45 = vmul.f32 %v2323_v44, %v2311_v22 }
 0x519   : > { %v1398_v46 = vpack.c.bf16 %v1394_v45, %v1393_v41  ;;  %1985 = vst.msk [vmem:[%s2914_s1 + $0x38] sm:$0xff] %vm960_vm3, %v1394_v45  ;;  %s2442_s1 = scalar_lea.vmem %s2441_s29, 2048 }
 0x51a   : > { %p2444_p7 = scmp.lt.s32.totalorder %s2442_s1, %s2436_s26 }
 0x51b   : > { %2130 = vmatmul.mubr.msk.bf16.vlgmr.msra.gmra.mxu0 %vm960_vm3, %v1398_v46 }
 0x51c   : > { %2145 = vmatprep.mubr.msk.bf16.mxu0 %vm2563_vm1, %v2562_v16  ;;  %2142 = vmatpush3.bf16.msra.mxu0 %v2282_v38  ;;  %p2445_p9 = por %p2444_p7, %p2443_p6 }
 0x51d   : > { %2143 = vmatprep.subr.bf16.mxu0 %v2562_v16 }
 0x51e   : > { %p2446_p12 = pnand %p2445_p9, %p2439_p0 }
 0x520   : > { %2144 = vmatpush3.bf16.msra.mxu0 %v2283_v39 }
 0x52b   : > { %v1023_v47 = vpop.f32.mrf.mxu0 }
 0x52c   : > { %v2015_v48 = vpack.c.bf16 %v1023_v47, %v1023_v47 }
 0x52d   : > { %v2095_v49 = vpop.f32.mrf.mxu0 }
 0x52e   : > { %1039 = vst.msk [vmem:[#allocation2] sm:$0xf] %vm1038_vm4, %v2015_v48  ;;  %v1994_v48 = vld [vmem:[%s3109_s11] ss:$0 sm:$0xff] }
 0x52f   : > { %v1026_v50 = vpop.f32.mrf.mxu0 }
 0x530   : > { %v2016_v51 = vpack.c.bf16 %v1026_v50, %v1026_v50 }
 0x531   : > { %v2096_v52 = vpop.f32.mrf.mxu0 }
 0x532   : > { %1040 = vst.msk [vmem:[#allocation2 + $0x4] sm:$0xf] %vm1038_vm4, %v2016_v51  ;;  %v1995_v52 = vld [vmem:[%s3110_s12] ss:$0 sm:$0xff] }
 0x59f   : > { %v1161_v53 = vpop.f32.mrf.mxu0 }
 0x5a0   : > { %v2017_v54 = vpack.c.bf16 %v1161_v53, %v1161_v53 }
 0x5a1   : > { %v2107_v55 = vpop.f32.mrf.mxu0 }
 0x5a2   : > { %1174 = vrot.lane.b32.xlu1 %v2017_v54, %s2567_s19 }
 0x5a3   : > { %v1164_v56 = vpop.f32.mrf.mxu0 }
 0x5a4   : > { %v2018_v57 = vpack.c.bf16 %v1164_v56, %v1164_v56 }
 0x5a5   : > { %v2108_v58 = vpop.f32.mrf.mxu0 }
 0x5a6   : > { %1176 = vrot.lane.b32.xlu0 %v2018_v57, %s2567_s19  ;;  %v2284_v57 = vld [vmem:[%s3113_s15 + $0x18] sm:$0xff]   ;;  %v2285_v58 = vld [vmem:[%s3113_s15 + $0x10] sm:$0xff]  }
 0x5a7   : > { %v1300_v59 = vpop.f32.mrf.mxu0 }
 0x5a8   : > { %v2019_v60 = vpack.c.bf16 %v1300_v59, %v1300_v59  ;;  %v2286_v59 = vld [vmem:[%s3113_s15 + $0x8] sm:$0xff]  }
 0x5a9   : > { %v2119_v61 = vpop.f32.mrf.mxu0 }
 0x5aa   : > { %1313 = vrot.lane.b32.xlu1 %v2019_v60, %s2568_s21  ;;  %v2287_v60 = vld [vmem:[%s3113_s15] sm:$0xff]  }
 0x5ab   : > { %v1303_v62 = vpop.f32.mrf.mxu0  ;;  %v1996_v61 = vld [vmem:[%s3112_s14] ss:$0 sm:$0xff] }
 0x5ac   : > { %v2020_v63 = vpack.c.bf16 %v1303_v62, %v1303_v62 }
 0x5ad   : > { %v2120_v3 = vpop.f32.mrf.mxu0 }
 0x5ae   : > { %1315 = vrot.lane.b32.xlu0 %v2020_v63, %s2568_s21  ;;  %s3008_s21 = scalar_lea.hbm %s3116_s18, %s2024_s0 }
 0x5db   : > { %v1439_v6 = vpop.f32.mrf.mxu0 }
 0x5dc   : > { %v2021_v7 = vpack.c.bf16 %v1439_v6, %v1439_v6 }
 0x5dd   : > { %v2131_v8 = vpop.f32.mrf.mxu0 }
 0x5de   : > { %1452 = vrot.lane.b32.xlu1 %v2021_v7, %s2569_s25 }
 0x5df   : > { %v1442_v9 = vpop.f32.mrf.mxu0 }
 0x5e0   : > { %v2022_v10 = vpack.c.bf16 %v1442_v9, %v1442_v9 }
 0x5e1   : > { %v2132_v11 = vpop.f32.mrf.mxu0 }
 0x5e2   : > { %1454 = vrot.lane.b32.xlu0 %v2022_v10, %s2569_s25  ;;  %s1754_s25 = scalar_lea.sflag [#allocation13], %s2909_s7 }
 0x614   : > { %v1175_v12 = vpop.permute.xlu1 %1174 }
 0x615   : > { %1181 = vst.msk [vmem:[#allocation2] sm:$0xf] %vm1180_vm5, %v1175_v12 }
 0x618   : > { %v1177_v13 = vpop.permute.xlu0 %1176 }
 0x619   : > { %1182 = vst.msk [vmem:[#allocation2 + $0x4] sm:$0xf] %vm1180_vm5, %v1177_v13 }
 0x61c   : > { %v1314_v14 = vpop.permute.xlu1 %1313 }
 0x61d   : > { %1320 = vst.msk [vmem:[#allocation2] sm:$0xf] %vm1319_vm6, %v1314_v14 }
 0x620   : > { %v1316_v15 = vpop.permute.xlu0 %1315 }
 0x621   : > { %1321 = vst.msk [vmem:[#allocation2 + $0x4] sm:$0xf] %vm1319_vm6, %v1316_v15 }
 0x650   : > { %v1453_v17 = vpop.permute.xlu1 %1452 }
 0x651   : > { %1459 = vst.msk [vmem:[#allocation2] sm:$0xf] %vm1458_vm7, %v1453_v17 }
 0x654   : > { %v1455_v18 = vpop.permute.xlu0 %1454 }
 0x655   : > { %1460 = vst.msk [vmem:[#allocation2 + $0x4] sm:$0xf] %vm1458_vm7, %v1455_v18 }
 0x65c   : > { %v2281_v19 = vld [vmem:[#allocation2] sm:$0xff]  }
 0x65d   : > { %2138 = vmatmul.mubr.msk.bf16.vlgmr.msra.gmra.mxu1 %vm667_vm0, %v2281_v19 }
 0x65e   : > { %2157 = vmatprep.mubr.msk.bf16.mxu1 %vm2563_vm1, %v2562_v16  ;;  %2150 = vmatpush3.bf16.msra.mxu1 %v2284_v57 }
 0x65f   : > { %2151 = vmatprep.subr.bf16.mxu1 %v2562_v16 }
 0x662   : > { %2152 = vmatpush3.bf16.msra.mxu1 %v2285_v58 }
 0x663   : > { %2153 = vmatprep.subr.bf16.mxu1 %v2562_v16 }
 0x666   : > { %2154 = vmatpush3.bf16.msra.mxu1 %v2286_v59 }
 0x667   : > { %2155 = vmatprep.subr.bf16.mxu1 %v2562_v16 }
 0x66a   : > { %2156 = vmatpush3.bf16.msra.mxu1 %v2287_v60 }
 0x71d   : > { %v1528_v21 = vpop.f32.mrf.mxu1 }
 0x71e   : > { %v1529_v22 = vadd.f32 %v1989_v20, %v1528_v21 }
 0x71f   : > { %v2139_v23 = vpop.f32.mrf.mxu1 }
 0x720   : > { %v2962_v24 = vadd.f32 %v1529_v22, %v2804_v0 }
 0x721   : > { %v1531_v25 = vpop.f32.mrf.mxu1 }
 0x722   : > { %v1532_v26 = vadd.f32 %v1989_v20, %v1531_v25  ;;  %v1539_v27 = vsel %vm667_vm0, %v2962_v24, 0.0 }
 0x723   : > { %1540 = vadd.xlane.f32.xlu1 %v1539_v27  ;;  %v2140_v28 = vpop.f32.mrf.mxu1 }
 0x724   : > { %v2967_v29 = vadd.f32 %v1532_v26, %v2806_v1 }
 0x726   : > { %v1542_v30 = vsel %vm667_vm0, %v2967_v29, 0.0 }
 0x727   : > { %1543 = vadd.xlane.f32.xlu0 %v1542_v30 }
 0x7ac   : > { %v1541_v31 = vpop.xlane.xlu1 %1540 }
 0x7ad   : > { %v1545_v32 = vmul.f32 0.03125, %v1541_v31 }
 0x7af   : > { %v1547_v33 = vsub.f32 %v2962_v24, %v1545_v32 }
 0x7b0   : > { %v1544_v0 = vpop.xlane.xlu0 %1543 }
 0x7b1   : > { %v1546_v2 = vmul.f32 0.03125, %v1544_v0  ;;  %v1549_v34 = vmul.f32 %v1547_v33, %v1547_v33 }
 0x7b3   : > { %v1548_v35 = vsub.f32 %v2967_v29, %v1546_v2  ;;  %v1551_v36 = vsel %vm667_vm0, %v1549_v34, 0.0 }
 0x7b4   : > { %1552 = vadd.xlane.f32.xlu0 %v1551_v36 }
 0x7b5   : > { %v1550_v37 = vmul.f32 %v1548_v35, %v1548_v35 }
 0x7b7   : > { %v1554_v1 = vsel %vm667_vm0, %v1550_v37, 0.0 }
 0x7b8   : > { %1555 = vadd.xlane.f32.xlu0 %v1554_v1 }
 0x83d   : > { %v1553_v40 = vpop.xlane.xlu0 %1552 }
 0x83e   : > { %v1557_v41 = vmul.f32 0.03125, %v1553_v40 }
 0x840   : > { %v1559_v42 = vadd.f32 1e-06, %v1557_v41 }
 0x841   : > { %v1556_v43 = vpop.xlane.xlu0 %1555 }
 0x842   : > { %2324 = vrsqrt.f32 %v1559_v42  ;;  %v1558_v44 = vmul.f32 0.03125, %v1556_v43 }
 0x844   : > { %v1560_v45 = vadd.f32 1e-06, %v1558_v44 }
 0x846   : > { %2326 = vrsqrt.f32 %v1560_v45 }
 0x84f   : > { %v2325_v46 = vpop.eup %2324 }
 0x850   : > { %v1563_v47 = vmul.f32 %v2325_v46, %v1547_v33 }
 0x852   : > { %v1571_v51 = vmul.f32 %v1994_v48, %v1563_v47 }
 0x853   : > { %v2327_v49 = vpop.eup %2326 }
 0x854   : > { %v1564_v50 = vmul.f32 %v2327_v49, %v1548_v35  ;;  %v1579_v54 = vadd.f32 %v1995_v52, %v1571_v51 }
 0x856   : > { %v1572_v53 = vmul.f32 %v1994_v48, %v1564_v50 }
 0x858   : > { %v1580_v55 = vadd.f32 %v1995_v52, %v1572_v53 }
 0x85a   : > { %v1581_v56 = vpack.c.bf16 %v1580_v55, %v1579_v54 }
 0x85c   : > { %2146 = vmatmul.mubr.msk.bf16.vlgmr.msra.gmra.mxu0 %vm667_vm0, %v1581_v56 }
 0x91c   : > { %v1642_v62 = vpop.f32.mrf.mxu0 }
 0x91d   : > { %v1643_v63 = vadd.f32 %v1996_v61, %v1642_v62 }
 0x91e   : > { %v2147_v3 = vpop.f32.mrf.mxu0 }
 0x91f   : > { %v1651_v4 = vmul.f32 0.70710677, %v1643_v63  ;;  %v1649_v11 = vmul.f32 0.5, %v1643_v63 }
 0x920   : > { %v1645_v5 = vpop.f32.mrf.mxu0 }
 0x921   : > { %2328 = verf.f32 %v1651_v4  ;;  %v1646_v6 = vadd.f32 %v1996_v61, %v1645_v5 }
 0x922   : > { %v2148_v7 = vpop.f32.mrf.mxu0 }
 0x923   : > { %v1652_v16 = vmul.f32 0.70710677, %v1646_v6  ;;  %v1650_v12 = vmul.f32 0.5, %v1646_v6 }
 0x925   : > { %2330 = verf.f32 %v1652_v16 }
 0x92e   : > { %v2329_v8 = vpop.eup %2328 }
 0x92f   : > { %v1655_v9 = vadd.f32 1.0, %v2329_v8 }
 0x931   : > { %v1657_v14 = vmul.f32 %v1655_v9, %v1649_v11 }
 0x932   : > { %v2331_v10 = vpop.eup %2330 }
 0x933   : > { %v1656_v13 = vadd.f32 1.0, %v2331_v10 }
 0x935   : > { %v1658_v15 = vmul.f32 %v1656_v13, %v1650_v12 }
 0x937   : > { %v1659_v17 = vpack.c.bf16 %v1658_v15, %v1657_v14 }
 0x939   : > { %2158 = vmatmul.mubr.msk.bf16.vlgmr.msra.gmra.mxu1 %vm1699_vm8, %v1659_v17 }
 0x93a   : > { %2449 = shalt.err (!%p2446_p12)
}
 0x93b   : > { %s2450_s27 = scalar_lea.hbm %s3008_s21, 1024  ;;  %s2454_s24 = scalar_lea.hbm %s3116_s18, 2048 }
 0x93c   : > { %p2451_p2 = scmp.ne.s32.totalorder %s3008_s21, %s2450_s27  ;;  %p2455_p5 = scmp.lt.s32.totalorder %s3008_s21, %s3116_s18 }
 0x93d   : > { %p2456_p10 = scmp.lt.s32.totalorder %s2454_s24, %s2450_s27 }
 0x93e   : > { %p2452_p1 = pnand %p2451_p2, %p2708_p4 }
 0x93f   : > { %p2457_p11 = por %p2456_p10, %p2455_p5 }
 0x940   : > { %p2453_p3 = pneg %p2452_p1 }
 0x942   : > { %p2458_p13 = pnand %p2457_p11, %p2453_p3 }
 0x944   : > { %2461 = shalt.err (!%p2458_p13)
}
 0x945   : > { %s2571_s26 = smov 128   ;;  %v2000_v18 = vld [vmem:[%s3114_s16] ss:$0 sm:$0xff]  ;;  %s1949_s27 = sshll.u32 %s2909_s7, 4 }
 0x946   : > { %2178 = dma.vmem_to_hbm [thread:$0]  (%p2708_p4), %s3002_s22, 1024, %s3008_s21, %s1754_s25, %s2571_s26, %s2571_s26, %s2567_s19  }
 0x947   : > { %s2023_s23 = sshll.u32 %s2546_s30, 8  ;;  %s647_s0 = scalar_lea.vmem [#allocation11], %s1949_s27 }
 0x948   : > { %s1769_s24 = sshll.u32 %s647_s0, 4  ;;  %s3146_s25 = sld [smem:[#allocation30_spill]]  ;;  %s3049_s24 = int_to_ptr.vmem [resolvable:$true] %s1769_s24 }
 0x949   : > { %s1749_s30 = scalar_lea.sflag [#allocation5], %s2909_s7  ;;  %s2462_s20 = scalar_lea.vmem %s3049_s24, 256 }
 0x94a   : > { %p2463_p0 = scmp.ne.s32.totalorder %s3049_s24, %s2462_s20  ;;  %s2572_s29 = smov [#allocation11]  }
 0x94b   : > { %s2466_s1 = sshll.u32 %s2572_s29, 4  ;;  %s2467_s1 = int_to_ptr.vmem [resolvable:$false] %s2466_s1 }
 0x94c   : > { %p2464_p6 = pnand %p2463_p0, %p2708_p4  ;;  %s2468_s27 = scalar_lea.vmem %s2467_s1, 512 }
 0x94d   : > { %p2469_p9 = scmp.lt.s32.totalorder %s3049_s24, %s2467_s1  ;;  %p2470_p12 = scmp.lt.s32.totalorder %s2468_s27, %s2462_s20 }
 0x94e   : > { %s3047_s17 = scalar_lea.hbm %s3146_s25, %s2023_s23  ;;  %p2465_p7 = pneg %p2464_p6 }
 0x94f   : > { %p2471_p2 = por %p2470_p12, %p2469_p9 }
 0x951   : > { %p2472_p1 = pnand %p2471_p2, %p2465_p7 }
 0x9f9   : > { %v1737_v19 = vpop.f32.mrf.mxu1 }
 0x9fa   : > { %v1738_v20 = vadd.f32 %v2000_v18, %v1737_v19 }
 0x9fb   : > { %v2159_v21 = vpop.f32.mrf.mxu1 }
 0x9fc   : > { %v1744_v22 = vadd.f32 %v1738_v20, %v2962_v24 }
 0x9fd   : > { %v1740_v23 = vpop.f32.mrf.mxu1 }
 0x9fe   : > { %1746 = vst.msk [vmem:[%s647_s0] sm:$0xff] %vm667_vm0, %v1744_v22  ;;  %v1741_v25 = vadd.f32 %v2000_v18, %v1740_v23 }
 0x9ff   : > { %v2160_v26 = vpop.f32.mrf.mxu1 }
 0xa00   : > { %v1745_v27 = vadd.f32 %v1741_v25, %v2967_v29 }
 0xa02   : > { %1747 = vst.msk [vmem:[%s647_s0 + $0x8] sm:$0xff] %vm667_vm0, %v1745_v27 }
 0xa03   : > { %2475 = shalt.err (!%p2472_p1)
}
 0xa04   : > { %s2476_s23 = scalar_lea.hbm %s3047_s17, 256  ;;  %s2480_s22 = scalar_lea.hbm %s3146_s25, 512 }
 0xa05   : > { %p2477_p3 = scmp.ne.s32.totalorder %s3047_s17, %s2476_s23  ;;  %p2481_p11 = scmp.lt.s32.totalorder %s3047_s17, %s3146_s25 }
 0xa06   : > { %p2482_p13 = scmp.lt.s32.totalorder %s2480_s22, %s2476_s23 }
 0xa07   : > { %p2478_p5 = pnand %p2477_p3, %p2708_p4 }
 0xa08   : > { %p2483_p0 = por %p2482_p13, %p2481_p11 }
 0xa09   : > { %p2479_p10 = pneg %p2478_p5 }
 0xa0b   : > { %p2484_p6 = pnand %p2483_p0, %p2479_p10 }
 0xa0d   : > { %2487 = shalt.err (!%p2484_p6)
}
 0xa0e   : > { %2177 = dma.vmem_to_hbm [thread:$0]  (%p2708_p4), %s3049_s24, 256, %s3047_s17, %s1749_s30, %s2571_s26, %s2571_s26, %s2567_s19  }
 0xa0f PF: > { %s3147_s20 = sld [smem:[#allocation22_spill]] }
 0xa10   : > { %s3148_s1 = sld [smem:[#allocation19_spill]] }
 0xa15   : > { %p2209_p7 = scmp.ge.s32.totalorder %s3147_s20, 2 }
 0xa16   : > { %s1802_s7 = sand.u32 1, %s3148_s1  }
 0xa17   : > { %p2195_p9 = pnand %p2209_p7, %p2715_p8  ;;  %s1803_s23 = scalar_lea.sflag [#allocation5], %s1802_s7 }
 0xa19   : > { %p2196_p12 = pneg %p2195_p9 }
 0xa1b   : > { %2525 = dma.done.wait (%p2196_p12), %s1803_s23, 256  }
 0xa1c   : > { %2527 = vsyncadd (%p2196_p12), %s1803_s23, 4294967040  ;;  %s1812_s0 = scalar_lea.sflag [#allocation13], %s1802_s7 }
 0xa1d   : > { %2529 = dma.done.wait (%p2196_p12), %s1812_s0, 1024  }
 0xa1e   : > { %2531 = vsyncadd (%p2196_p12), %s1812_s0, 4294966272  ;;  %s38_s19 = sadd.s32 1, %s3147_s20   ;;  %s3150_s2 = sld [smem:[#allocation20_spill]] }
 0xa1f   : > { %p35_p2 = scmp.ge.s32.totalorder %s38_s19, 4   ;;  %s3151_s29 = sld [smem:[#allocation25_spill]] }
 0xa20   : > { %s3152_s30 = sld [smem:[#allocation21_spill]]  ;;  %s3154_s27 = smov %s2538_s28 }
 0xa21   : > { %s3153_s0 = sld [smem:[#allocation23_spill]]  ;;  %37 = sbr.rel (!%p35_p2) target bundleno = 15 (0xf), region = 160 }
 0xa24   : > { %s3155_s28 = smov %s3150_s2 }
 0xa26   :  { %1817 = vsyncpa [#allocation4], 1 }
 0xa27   :  { %1819 = vsyncpa [#allocation4 + $0x1], 1 }
 0xa28   :  { %1820 = vsyncpa [#allocation7], 1 }
 0xa29   :  { %1821 = vsyncpa [#allocation10], 1 }
 0xa2a   :  { %1822 = vsyncpa [#allocation5], 1 }
 0xa2b   :  { %1824 = vsyncpa [#allocation5 + $0x1], 1 }
 0xa2c   :  { %1825 = vsyncpa [#allocation13], 1 }
 0xa2d   :  { %1827 = vsyncpa [#allocation13 + $0x1], 1 }

</bundles_post_ra>
